<compile_context>
chip_gen: v5e
topology: v5e:2x2
jax: 0.10.0
libtpu: 0.0.40
codegen_flags: <defaults>
</compile_context>

<pallas_src>
import math
from functools import partial

import numpy as np
import jax
import jax.numpy as jnp
from jax.experimental import pallas as pl
from jax.experimental.pallas import tpu as pltpu


def _layer_norm(x, gamma, beta, eps=1e-5):
    # x: (TQ, D); gamma/beta: (1, D). Biased variance, matching torch.nn.LayerNorm.
    mean = jnp.mean(x, axis=-1, keepdims=True)
    centered = x - mean
    var = jnp.mean(centered * centered, axis=-1, keepdims=True)
    inv = jax.lax.rsqrt(var + eps)
    return centered * inv * gamma + beta


def transformer_block_kernel(
    x_kv_ref, x_q_ref,
    wq_ref, bq_ref, wk_ref, bk_ref, wv_ref, bv_ref,
    g1_ref, be1_ref,
    w1_ref, b1_ref, w2_ref, b2_ref,
    g2_ref, be2_ref,
    out_ref, attn_ref,
    k_cache, v_cache, ctx_ref,
    *, num_heads, ffn_chunk, unroll_heads,
):
    TQ = x_q_ref.shape[1]
    D = x_q_ref.shape[2]
    H = num_heads
    hd = D // H

    x_q = x_q_ref[0]                          # (TQ, D) f32 (residual / LN path)
    xq_bf = x_q.astype(jnp.bfloat16)

    # ---- K/V projections: once per batch element, cached across query tiles ----
    @pl.when(pl.program_id(1) == 0)
    def _():
        x_kv = x_kv_ref[0]                    # (S, D) bf16
        k_cache[...] = (jnp.dot(x_kv, wk_ref[...], preferred_element_type=jnp.float32)
                        + bk_ref[...]).astype(jnp.bfloat16)
        v_cache[...] = (jnp.dot(x_kv, wv_ref[...], preferred_element_type=jnp.float32)
                        + bv_ref[...]).astype(jnp.bfloat16)

    # ---- Q projection (1/sqrt(hd) already folded into W_q / b_q on the host) ----
    q = (jnp.dot(xq_bf, wq_ref[...], preferred_element_type=jnp.float32)
         + bq_ref[...]).astype(jnp.bfloat16)  # (TQ, D)

    def attend(qh, kh, vh):
        # scores = qh @ kh^T via dot_general (contract last dims, no transpose).
        scores = jax.lax.dot_general(
            qh, kh, dimension_numbers=(((1,), (1,)), ((), ())),
            preferred_element_type=jnp.float32)                 # (TQ, S)
        m = jnp.max(scores, axis=-1, keepdims=True)
        e = jnp.exp(scores - m)
        denom = jnp.sum(e, axis=-1, keepdims=True)
        attn_h = e * pl.reciprocal(denom, approx=True)          # EUP slot, frees VALU
        ctx_h = jnp.dot(attn_h.astype(jnp.bfloat16), vh,
                        preferred_element_type=jnp.float32)     # (TQ, hd)
        return attn_h, ctx_h

    if unroll_heads:
        # Small H: static lane slices, fully unrolled.
        for h in range(H):
            sl = slice(h * hd, (h + 1) * hd)
            attn_h, ctx_h = attend(q[:, sl], k_cache[:, sl], v_cache[:, sl])
            attn_ref[0, h] = attn_h.astype(attn_ref.dtype)
            ctx_ref[:, sl] = ctx_h
    else:
        # Large H: fori_loop bounds live ranges to one head at a time.
        def head_body(h, carry):
            off = pl.multiple_of(h * hd, hd)
            attn_h, ctx_h = attend(
                jax.lax.dynamic_slice_in_dim(q, off, hd, axis=1),
                k_cache[:, pl.ds(off, hd)],
                v_cache[:, pl.ds(off, hd)])
            attn_ref[0, h] = attn_h.astype(attn_ref.dtype)
            ctx_ref[:, pl.ds(off, hd)] = ctx_h
            return carry
        jax.lax.fori_loop(0, H, head_body, 0)

    # ---- residual + LayerNorm 1 ----
    h1 = _layer_norm(x_q + ctx_ref[...], g1_ref[...], be1_ref[...])
    h1_bf = h1.astype(jnp.bfloat16)

    # ---- feed-forward, chunked over the hidden dim (bf16 MXU, f32 accumulation) ----
    hidden = w1_ref.shape[1]
    ff = jnp.zeros((TQ, D), jnp.float32)
    for c0 in range(0, hidden, ffn_chunk):
        c1 = min(c0 + ffn_chunk, hidden)
        part = (jnp.dot(h1_bf, w1_ref[:, c0:c1], preferred_element_type=jnp.float32)
                + b1_ref[:, c0:c1])
        part = jnp.maximum(part, 0.0).astype(jnp.bfloat16)
        ff = ff + jnp.dot(part, w2_ref[c0:c1, :], preferred_element_type=jnp.float32)
    ff = ff + b2_ref[...]

    # ---- residual + LayerNorm 2 ----
    out_ref[0] = _layer_norm(h1 + ff, g2_ref[...], be2_ref[...]).astype(out_ref.dtype)


def transformer_block(x, params, num_heads, *, q_tile=None, attn_dtype=jnp.bfloat16):
    """x: (B, S, D) float32.  Returns (out (B,S,D) f32, attn_weights (B,H,S,S) attn_dtype)."""
    B, S, D = x.shape
    H = num_heads
    assert D % H == 0, "input_dim must be divisible by num_heads"
    hd = D // H
    hidden = params['w1'].shape[0]

    # ---- chip VMEM capacity (clamp budget; v7x = 64 MiB, v5e/v6e = 128 MiB) ----
    try:
        vmem_cap = int(pltpu.get_tpu_info().vmem_capacity_bytes)
    except Exception:
        vmem_cap = 64 << 20   # conservative (v7x-sized) fallback

    # Query tile: bigger on 128 MiB chips (fewer grid steps / weight revisits),
    # 256 on v7x-sized VMEM. Second grid axis is "arbitrary" (K/V cache carry).
    if q_tile is None:
        target = 512 if vmem_cap >= (96 << 20) else 256
        q_tile = S if S <= target else target
    assert S % q_tile == 0, "S must be divisible by the query tile"
    TQ = q_tile
    NQ = S // TQ

    # FFN hidden-dim chunk (bounds the (TQ, hidden) f32 intermediate).
    ffn_chunk = hidden if hidden <= 2048 else 1024

    # ---- one-time host-side parameter transforms ----
    wdt = jnp.bfloat16
    scale = 1.0 / math.sqrt(hd)
    wq_t = (params['wq'].T * scale).astype(wdt)   # (D, D), scale folded in
    bq_s = (params['bq'] * scale).astype(jnp.float32)
    wk_t = params['wk'].T.astype(wdt)             # (D, D)
    wv_t = params['wv'].T.astype(wdt)             # (D, D)
    w1_t = params['w1'].T.astype(wdt)             # (D, hidden)
    w2_t = params['w2'].T.astype(wdt)             # (hidden, D)
    x_kv = x.astype(wdt)                          # bf16 copy for the K/V path only

    attn_isz = np.dtype(attn_dtype).itemsize

    # ---- VMEM budget (single-buffered weights; activations counted at tile size) ----
    weight_bytes = 2 * (3 * D * D + 2 * D * hidden) + 4 * (hidden + 7 * D)
    act_bytes = (2 * 2 * S * D                       # x_kv bf16 (double-buffered)
                 + 2 * 4 * TQ * D                    # x_q f32 (double-buffered)
                 + 2 * 4 * TQ * D                    # out f32 (double-buffered)
                 + 2 * attn_isz * H * TQ * S         # attn out (double-buffered)
                 + 2 * 2 * S * D                     # K/V bf16 caches
                 + 4 * TQ * D                        # ctx scratch
                 + 4 * (3 * TQ * D + 2 * TQ * S + TQ * ffn_chunk))   # temporaries
    vmem_limit = 2 * weight_bytes + act_bytes + (8 << 20)
    vmem_limit = int(max(min(vmem_limit, vmem_cap - (4 << 20)), 16 << 20))

    # ---- advisory cost estimate (K/V projected once per batch element) ----
    flops = B * (2 * 2 * S * D * D                   # K, V projections
                 + 2 * S * D * D                     # Q projection (all tiles)
                 + 2 * 2 * H * S * S * hd            # scores + attn@V
                 + 2 * 2 * S * D * hidden)           # fc1 + fc2
    transcendentals = B * H * S * S
    bytes_accessed = (2 * B * S * D + 4 * B * S * D  # x_kv + x_q reads
                      + 4 * B * S * D                # out
                      + attn_isz * B * H * S * S     # attn out
                      + weight_bytes)

    kernel = partial(transformer_block_kernel, num_heads=H,
                     ffn_chunk=ffn_chunk, unroll_heads=(H <= 8))

    out_shape = (jax.ShapeDtypeStruct((B, S, D), jnp.float32),
                 jax.ShapeDtypeStruct((B, H, S, S), attn_dtype))
    compiler_params = pltpu.CompilerParams(
        dimension_semantics=("parallel", "arbitrary"),
        vmem_limit_bytes=vmem_limit)
    cost = pl.CostEstimate(flops=int(flops), transcendentals=int(transcendentals),
                           bytes_accessed=int(bytes_accessed))

    def build_call(single_buffer_weights):
        def wspec(shape):
            kw = {}
            if single_buffer_weights:
                # Constant-index blocks: fetch once, revisit — no second buffer needed.
                kw['pipeline_mode'] = pl.Buffered(1)
            return pl.BlockSpec(shape, lambda b, qi, _n=len(shape): (0,) * _n, **kw)

        weight_specs = [
            wspec((D, D)), wspec((1, D)),            # W_q (scaled), b_q (scaled)
            wspec((D, D)), wspec((1, D)),            # W_k, b_k
            wspec((D, D)), wspec((1, D)),            # W_v, b_v
            wspec((1, D)), wspec((1, D)),            # norm1 gamma, beta
            wspec((D, hidden)), wspec((1, hidden)),  # fc1 (pre-transposed)
            wspec((hidden, D)), wspec((1, D)),       # fc2 (pre-transposed)
            wspec((1, D)), wspec((1, D)),            # norm2 gamma, beta
        ]

        grid_spec = pltpu.PrefetchScalarGridSpec(
            num_scalar_prefetch=0,
            grid=(B, NQ),
            in_specs=[
                pl.BlockSpec((1, S, D), lambda b, qi: (b, 0, 0)),    # bf16 x for K/V
                pl.BlockSpec((1, TQ, D), lambda b, qi: (b, qi, 0)),  # f32 query tile
            ] + weight_specs,
            out_specs=[
                pl.BlockSpec((1, TQ, D), lambda b, qi: (b, qi, 0)),
                pl.BlockSpec((1, H, TQ, S), lambda b, qi: (b, 0, qi, 0)),
            ],
            scratch_shapes=[
                pltpu.VMEM((S, D), jnp.bfloat16),    # K cache (persists over qi)
                pltpu.VMEM((S, D), jnp.bfloat16),    # V cache (persists over qi)
                pltpu.VMEM((TQ, D), jnp.float32),    # per-head ctx assembly
            ],
        )
        return pl.pallas_call(
            kernel, out_shape=out_shape, grid_spec=grid_spec,
            compiler_params=compiler_params, cost_estimate=cost)

    args = (x_kv, x,
            wq_t, bq_s, wk_t, params['bk'], wv_t, params['bv'],
            params['g1'], params['be1'],
            w1_t, params['b1'], w2_t, params['b2'],
            params['g2'], params['be2'])

    try:
        out, attn = build_call(single_buffer_weights=True)(*args)
    except Exception:
        # Fallback if this Pallas build rejects buffer_count=1 pipeline_mode.
        out, attn = build_call(single_buffer_weights=False)(*args)
    return out, attn


def init_params(key, input_dim, hidden_dim):
    ks = jax.random.split(key, 10)

    def linear_init(kw, kb, out_f, in_f):
        bound = 1.0 / math.sqrt(in_f)
        w = jax.random.uniform(kw, (out_f, in_f), jnp.float32, -bound, bound)
        b = jax.random.uniform(kb, (1, out_f), jnp.float32, -bound, bound)
        return w, b

    wq, bq = linear_init(ks[0], ks[1], input_dim, input_dim)
    wk, bk = linear_init(ks[2], ks[3], input_dim, input_dim)
    wv, bv = linear_init(ks[4], ks[5], input_dim, input_dim)
    w1, b1 = linear_init(ks[6], ks[7], hidden_dim, input_dim)
    w2, b2 = linear_init(ks[8], ks[9], input_dim, hidden_dim)

    return {
        'wq': wq, 'bq': bq, 'wk': wk, 'bk': bk, 'wv': wv, 'bv': bv,
        'g1': jnp.ones((1, input_dim), jnp.float32),
        'be1': jnp.zeros((1, input_dim), jnp.float32),
        'w1': w1, 'b1': b1, 'w2': w2, 'b2': b2,
        'g2': jnp.ones((1, input_dim), jnp.float32),
        'be2': jnp.zeros((1, input_dim), jnp.float32),
    }


def reference_forward(x, params, num_heads):
    """Pure-JAX f32 reference mirroring the PyTorch module, for a sanity check."""
    B, S, D = x.shape
    H = num_heads
    hd = D // H
    q = x @ params['wq'].T + params['bq']
    k = x @ params['wk'].T + params['bk']
    v = x @ params['wv'].T + params['bv']
    qh = q.reshape(B, S, H, hd).transpose(0, 2, 1, 3)
    kh = k.reshape(B, S, H, hd).transpose(0, 2, 1, 3)
    vh = v.reshape(B, S, H, hd).transpose(0, 2, 1, 3)
    scores = jnp.einsum('bhqd,bhkd->bhqk', qh, kh) / math.sqrt(hd)
    attn = jax.nn.softmax(scores, axis=-1)
    ctx = jnp.einsum('bhqk,bhkd->bhqd', attn, vh)
    ctx = ctx.transpose(0, 2, 1, 3).reshape(B, S, D)

    def ln(y, g, b, eps=1e-5):
        mean = jnp.mean(y, axis=-1, keepdims=True)
        var = jnp.mean((y - mean) ** 2, axis=-1, keepdims=True)
        return (y - mean) / jnp.sqrt(var + eps) * g + b

    h1 = ln(x + ctx, params['g1'], params['be1'])
    ff = jnp.maximum(h1 @ params['w1'].T + params['b1'], 0.0) @ params['w2'].T + params['b2']
    h2 = ln(h1 + ff, params['g2'], params['be2'])
    return h2, attn


if __name__ == "__main__":
    B, S, D, H, HIDDEN = 2, 8, 32, 4, 64

    key = jax.random.PRNGKey(0)
    kx, kp = jax.random.split(key)
    x = jax.random.normal(kx, (B, S, D), jnp.float32)
    params = init_params(kp, D, HIDDEN)

    out, attn = transformer_block(x, params, num_heads=H)
    out = jax.block_until_ready(out)
    attn = jax.block_until_ready(attn)

    ref_out, ref_attn = reference_forward(x, params, H)
    assert out.shape == (B, S, D)
    assert attn.shape == (B, H, S, S)
    # Kernel uses bf16 matmul inputs, a bf16 attention-weights output, and the
    # approximate softmax reciprocal, so compare against the f32 reference with
    # bf16-level tolerances.
    assert jnp.allclose(out, ref_out, atol=5e-2, rtol=5e-2)
    assert jnp.allclose(attn.astype(jnp.float32), ref_attn, atol=3e-2, rtol=3e-2)

    print("KERNEL_OK")
</pallas_src>

<mosaic_0001>
module attributes {stable_mosaic.version = 11 : i64} {
  func.func @transformer_block_kernel(%arg0: i32, %arg1: i32, %arg2: memref<1x8x32xbf16, #tpu.memory_space<vmem>>, %arg3: memref<1x8x32xf32, #tpu.memory_space<vmem>>, %arg4: memref<32x32xbf16, #tpu.memory_space<vmem>>, %arg5: memref<1x32xf32, #tpu.memory_space<vmem>>, %arg6: memref<32x32xbf16, #tpu.memory_space<vmem>>, %arg7: memref<1x32xf32, #tpu.memory_space<vmem>>, %arg8: memref<32x32xbf16, #tpu.memory_space<vmem>>, %arg9: memref<1x32xf32, #tpu.memory_space<vmem>>, %arg10: memref<1x32xf32, #tpu.memory_space<vmem>>, %arg11: memref<1x32xf32, #tpu.memory_space<vmem>>, %arg12: memref<32x64xbf16, #tpu.memory_space<vmem>>, %arg13: memref<1x64xf32, #tpu.memory_space<vmem>>, %arg14: memref<64x32xbf16, #tpu.memory_space<vmem>>, %arg15: memref<1x32xf32, #tpu.memory_space<vmem>>, %arg16: memref<1x32xf32, #tpu.memory_space<vmem>>, %arg17: memref<1x32xf32, #tpu.memory_space<vmem>>, %arg18: memref<1x8x32xf32, #tpu.memory_space<vmem>>, %arg19: memref<1x4x8x8xbf16, #tpu.memory_space<vmem>>, %arg20: memref<8x32xbf16, #tpu.memory_space<vmem>>, %arg21: memref<8x32xbf16, #tpu.memory_space<vmem>>, %arg22: memref<8x32xf32, #tpu.memory_space<vmem>>) attributes {dimension_semantics = [#tpu.dimension_semantics<parallel>, #tpu.dimension_semantics<arbitrary>], iteration_bounds = array<i64: 2, 1>, scalar_prefetch = 0 : i64, scratch_operands = 3 : i64, tpu.core_type = #tpu.core_type<tc>, window_params = [{transform_indices = @transform_0, window_bounds = array<i64: 1, 8, 32>}, {transform_indices = @transform_1, window_bounds = array<i64: 1, 8, 32>}, {pipeline_mode = #tpu.pipeline_mode<synchronous>, transform_indices = @transform_2, window_bounds = array<i64: 32, 32>}, {pipeline_mode = #tpu.pipeline_mode<synchronous>, transform_indices = @transform_3, window_bounds = array<i64: 1, 32>}, {pipeline_mode = #tpu.pipeline_mode<synchronous>, transform_indices = @transform_4, window_bounds = array<i64: 32, 32>}, {pipeline_mode = #tpu.pipeline_mode<synchronous>, transform_indices = @transform_5, window_bounds = array<i64: 1, 32>}, {pipeline_mode = #tpu.pipeline_mode<synchronous>, transform_indices = @transform_6, window_bounds = array<i64: 32, 32>}, {pipeline_mode = #tpu.pipeline_mode<synchronous>, transform_indices = @transform_7, window_bounds = array<i64: 1, 32>}, {pipeline_mode = #tpu.pipeline_mode<synchronous>, transform_indices = @transform_8, window_bounds = array<i64: 1, 32>}, {pipeline_mode = #tpu.pipeline_mode<synchronous>, transform_indices = @transform_9, window_bounds = array<i64: 1, 32>}, {pipeline_mode = #tpu.pipeline_mode<synchronous>, transform_indices = @transform_10, window_bounds = array<i64: 32, 64>}, {pipeline_mode = #tpu.pipeline_mode<synchronous>, transform_indices = @transform_11, window_bounds = array<i64: 1, 64>}, {pipeline_mode = #tpu.pipeline_mode<synchronous>, transform_indices = @transform_12, window_bounds = array<i64: 64, 32>}, {pipeline_mode = #tpu.pipeline_mode<synchronous>, transform_indices = @transform_13, window_bounds = array<i64: 1, 32>}, {pipeline_mode = #tpu.pipeline_mode<synchronous>, transform_indices = @transform_14, window_bounds = array<i64: 1, 32>}, {pipeline_mode = #tpu.pipeline_mode<synchronous>, transform_indices = @transform_15, window_bounds = array<i64: 1, 32>}, {transform_indices = @transform_16, window_bounds = array<i64: 1, 8, 32>}, {transform_indices = @transform_17, window_bounds = array<i64: 1, 4, 8, 8>}]} {
    %c0 = arith.constant 0 : index
    %c0_0 = arith.constant 0 : index
    %c0_1 = arith.constant 0 : index
    %0 = vector.load %arg3[%c0, %c0_0, %c0_1] : memref<1x8x32xf32, #tpu.memory_space<vmem>>, vector<1x8x32xf32>
    %1 = vector.shape_cast %0 : vector<1x8x32xf32> to vector<8x32xf32>
    %2 = arith.truncf %1 : vector<8x32xf32> to vector<8x32xbf16>
    %c0_i32 = arith.constant 0 : i32
    %3 = arith.cmpi eq, %arg1, %c0_i32 : i32
    %4 = arith.extui %3 : i1 to i32
    %c0_i32_2 = arith.constant 0 : i32
    %5 = arith.cmpi ne, %4, %c0_i32_2 : i32
    scf.if %5 {
      %c0_92 = arith.constant 0 : index
      %c0_93 = arith.constant 0 : index
      %c0_94 = arith.constant 0 : index
      %162 = vector.load %arg2[%c0_92, %c0_93, %c0_94] : memref<1x8x32xbf16, #tpu.memory_space<vmem>>, vector<1x8x32xbf16>
      %163 = vector.shape_cast %162 : vector<1x8x32xbf16> to vector<8x32xbf16>
      %c0_95 = arith.constant 0 : index
      %c0_96 = arith.constant 0 : index
      %164 = vector.load %arg6[%c0_95, %c0_96] : memref<32x32xbf16, #tpu.memory_space<vmem>>, vector<32x32xbf16>
      %cst_97 = arith.constant dense<0.000000e+00> : vector<8x32xf32>
      %165 = tpu.matmul %163, %164, %cst_97 {dimension_numbers = #tpu.dot_dimension_numbers<[1], [0], [0], [1], [0, 0, 1, 1], [], []>} : vector<8x32xbf16>, vector<32x32xbf16>, vector<8x32xf32> -> vector<8x32xf32>
      %c0_98 = arith.constant 0 : index
      %c0_99 = arith.constant 0 : index
      %166 = vector.load %arg7[%c0_98, %c0_99] : memref<1x32xf32, #tpu.memory_space<vmem>>, vector<1x32xf32>
      %167 = vector.broadcast %166 : vector<1x32xf32> to vector<8x32xf32>
      %168 = arith.addf %165, %167 : vector<8x32xf32>
      %169 = arith.truncf %168 : vector<8x32xf32> to vector<8x32xbf16>
      %c0_100 = arith.constant 0 : index
      %c0_101 = arith.constant 0 : index
      %170 = vector.load %arg20[%c0_100, %c0_101] : memref<8x32xbf16, #tpu.memory_space<vmem>>, vector<8x32xbf16>
      tpu.vector_store %arg20[%c0_100, %c0_101], %169 {strides = array<i32>} : memref<8x32xbf16, #tpu.memory_space<vmem>>, vector<8x32xbf16>,
      %c0_102 = arith.constant 0 : index
      %c0_103 = arith.constant 0 : index
      %171 = vector.load %arg8[%c0_102, %c0_103] : memref<32x32xbf16, #tpu.memory_space<vmem>>, vector<32x32xbf16>
      %cst_104 = arith.constant dense<0.000000e+00> : vector<8x32xf32>
      %172 = tpu.matmul %163, %171, %cst_104 {dimension_numbers = #tpu.dot_dimension_numbers<[1], [0], [0], [1], [0, 0, 1, 1], [], []>} : vector<8x32xbf16>, vector<32x32xbf16>, vector<8x32xf32> -> vector<8x32xf32>
      %c0_105 = arith.constant 0 : index
      %c0_106 = arith.constant 0 : index
      %173 = vector.load %arg9[%c0_105, %c0_106] : memref<1x32xf32, #tpu.memory_space<vmem>>, vector<1x32xf32>
      %174 = vector.broadcast %173 : vector<1x32xf32> to vector<8x32xf32>
      %175 = arith.addf %172, %174 : vector<8x32xf32>
      %176 = arith.truncf %175 : vector<8x32xf32> to vector<8x32xbf16>
      %c0_107 = arith.constant 0 : index
      %c0_108 = arith.constant 0 : index
      %177 = vector.load %arg21[%c0_107, %c0_108] : memref<8x32xbf16, #tpu.memory_space<vmem>>, vector<8x32xbf16>
      tpu.vector_store %arg21[%c0_107, %c0_108], %176 {strides = array<i32>} : memref<8x32xbf16, #tpu.memory_space<vmem>>, vector<8x32xbf16>,
    } else {
    }
    %c0_3 = arith.constant 0 : index
    %c0_4 = arith.constant 0 : index
    %6 = vector.load %arg4[%c0_3, %c0_4] : memref<32x32xbf16, #tpu.memory_space<vmem>>, vector<32x32xbf16>
    %cst = arith.constant dense<0.000000e+00> : vector<8x32xf32>
    %7 = tpu.matmul %2, %6, %cst {dimension_numbers = #tpu.dot_dimension_numbers<[1], [0], [0], [1], [0, 0, 1, 1], [], []>} : vector<8x32xbf16>, vector<32x32xbf16>, vector<8x32xf32> -> vector<8x32xf32>
    %c0_5 = arith.constant 0 : index
    %c0_6 = arith.constant 0 : index
    %8 = vector.load %arg5[%c0_5, %c0_6] : memref<1x32xf32, #tpu.memory_space<vmem>>, vector<1x32xf32>
    %9 = vector.broadcast %8 : vector<1x32xf32> to vector<8x32xf32>
    %10 = arith.addf %7, %9 : vector<8x32xf32>
    %11 = arith.truncf %10 : vector<8x32xf32> to vector<8x32xbf16>
    %12 = vector.extract_strided_slice %11 {offsets = [0, 0], sizes = [8, 8], strides = [1, 1]} : vector<8x32xbf16> to vector<8x8xbf16>
    %c0_7 = arith.constant 0 : index
    %c0_8 = arith.constant 0 : index
    %13 = vector.load %arg20[%c0_7, %c0_8] : memref<8x32xbf16, #tpu.memory_space<vmem>>, vector<8x8xbf16>
    %c0_9 = arith.constant 0 : index
    %c0_10 = arith.constant 0 : index
    %14 = vector.load %arg21[%c0_9, %c0_10] : memref<8x32xbf16, #tpu.memory_space<vmem>>, vector<8x8xbf16>
    %cst_11 = arith.constant dense<0.000000e+00> : vector<8x8xf32>
    %15 = tpu.matmul %12, %13, %cst_11 {dimension_numbers = #tpu.dot_dimension_numbers<[1], [1], [0], [0], [0, 0, 1, 0], [], []>} : vector<8x8xbf16>, vector<8x8xbf16>, vector<8x8xf32> -> vector<8x8xf32>
    %cst_12 = arith.constant dense<0xFF800000> : vector<8xf32>
    %16 = vector.multi_reduction <maximumf>, %15, %cst_12 [1] : vector<8x8xf32> to vector<8xf32>
    %17 = vector.shape_cast %16 : vector<8xf32> to vector<8x1xf32>
    %18 = vector.broadcast %17 : vector<8x1xf32> to vector<8x8xf32>
    %19 = arith.subf %15, %18 : vector<8x8xf32>
    %20 = math.exp %19 : vector<8x8xf32>
    %cst_13 = arith.constant dense<0.000000e+00> : vector<8xf32>
    %21 = vector.multi_reduction <add>, %20, %cst_13 [1] : vector<8x8xf32> to vector<8xf32>
    %22 = vector.shape_cast %21 : vector<8xf32> to vector<8x1xf32>
    %23 = tpu.reciprocal %22 {approx = true} : vector<8x1xf32> -> vector<8x1xf32>
    %24 = vector.broadcast %23 : vector<8x1xf32> to vector<8x8xf32>
    %25 = arith.mulf %20, %24 : vector<8x8xf32>
    %26 = arith.truncf %25 : vector<8x8xf32> to vector<8x8xbf16>
    %cst_14 = arith.constant dense<0.000000e+00> : vector<8x8xf32>
    %27 = tpu.matmul %26, %14, %cst_14 {dimension_numbers = #tpu.dot_dimension_numbers<[1], [0], [0], [1], [0, 0, 1, 1], [], []>} : vector<8x8xbf16>, vector<8x8xbf16>, vector<8x8xf32> -> vector<8x8xf32>
    %28 = arith.truncf %25 : vector<8x8xf32> to vector<8x8xbf16>
    %c0_15 = arith.constant 0 : index
    %c0_16 = arith.constant 0 : index
    %c0_17 = arith.constant 0 : index
    %c0_18 = arith.constant 0 : index
    %29 = vector.load %arg19[%c0_15, %c0_16, %c0_17, %c0_18] : memref<1x4x8x8xbf16, #tpu.memory_space<vmem>>, vector<1x1x8x8xbf16>
    %30 = vector.shape_cast %29 : vector<1x1x8x8xbf16> to vector<8x8xbf16>
    %31 = vector.shape_cast %28 : vector<8x8xbf16> to vector<1x1x8x8xbf16>
    tpu.vector_store %arg19[%c0_15, %c0_16, %c0_17, %c0_18], %31 {strides = array<i32>} : memref<1x4x8x8xbf16, #tpu.memory_space<vmem>>, vector<1x1x8x8xbf16>,
    %c0_19 = arith.constant 0 : index
    %c0_20 = arith.constant 0 : index
    %32 = vector.load %arg22[%c0_19, %c0_20] : memref<8x32xf32, #tpu.memory_space<vmem>>, vector<8x8xf32>
    tpu.vector_store %arg22[%c0_19, %c0_20], %27 {strides = array<i32>} : memref<8x32xf32, #tpu.memory_space<vmem>>, vector<8x8xf32>,
    %33 = vector.extract_strided_slice %11 {offsets = [0, 8], sizes = [8, 8], strides = [1, 1]} : vector<8x32xbf16> to vector<8x8xbf16>
    %c0_21 = arith.constant 0 : index
    %c8 = arith.constant 8 : index
    %34 = vector.load %arg20[%c0_21, %c8] : memref<8x32xbf16, #tpu.memory_space<vmem>>, vector<8x8xbf16>
    %c0_22 = arith.constant 0 : index
    %c8_23 = arith.constant 8 : index
    %35 = vector.load %arg21[%c0_22, %c8_23] : memref<8x32xbf16, #tpu.memory_space<vmem>>, vector<8x8xbf16>
    %cst_24 = arith.constant dense<0.000000e+00> : vector<8x8xf32>
    %36 = tpu.matmul %33, %34, %cst_24 {dimension_numbers = #tpu.dot_dimension_numbers<[1], [1], [0], [0], [0, 0, 1, 0], [], []>} : vector<8x8xbf16>, vector<8x8xbf16>, vector<8x8xf32> -> vector<8x8xf32>
    %cst_25 = arith.constant dense<0xFF800000> : vector<8xf32>
    %37 = vector.multi_reduction <maximumf>, %36, %cst_25 [1] : vector<8x8xf32> to vector<8xf32>
    %38 = vector.shape_cast %37 : vector<8xf32> to vector<8x1xf32>
    %39 = vector.broadcast %38 : vector<8x1xf32> to vector<8x8xf32>
    %40 = arith.subf %36, %39 : vector<8x8xf32>
    %41 = math.exp %40 : vector<8x8xf32>
    %cst_26 = arith.constant dense<0.000000e+00> : vector<8xf32>
    %42 = vector.multi_reduction <add>, %41, %cst_26 [1] : vector<8x8xf32> to vector<8xf32>
    %43 = vector.shape_cast %42 : vector<8xf32> to vector<8x1xf32>
    %44 = tpu.reciprocal %43 {approx = true} : vector<8x1xf32> -> vector<8x1xf32>
    %45 = vector.broadcast %44 : vector<8x1xf32> to vector<8x8xf32>
    %46 = arith.mulf %41, %45 : vector<8x8xf32>
    %47 = arith.truncf %46 : vector<8x8xf32> to vector<8x8xbf16>
    %cst_27 = arith.constant dense<0.000000e+00> : vector<8x8xf32>
    %48 = tpu.matmul %47, %35, %cst_27 {dimension_numbers = #tpu.dot_dimension_numbers<[1], [0], [0], [1], [0, 0, 1, 1], [], []>} : vector<8x8xbf16>, vector<8x8xbf16>, vector<8x8xf32> -> vector<8x8xf32>
    %49 = arith.truncf %46 : vector<8x8xf32> to vector<8x8xbf16>
    %c0_28 = arith.constant 0 : index
    %c1 = arith.constant 1 : index
    %c0_29 = arith.constant 0 : index
    %c0_30 = arith.constant 0 : index
    %50 = vector.load %arg19[%c0_28, %c1, %c0_29, %c0_30] : memref<1x4x8x8xbf16, #tpu.memory_space<vmem>>, vector<1x1x8x8xbf16>
    %51 = vector.shape_cast %50 : vector<1x1x8x8xbf16> to vector<8x8xbf16>
    %52 = vector.shape_cast %49 : vector<8x8xbf16> to vector<1x1x8x8xbf16>
    tpu.vector_store %arg19[%c0_28, %c1, %c0_29, %c0_30], %52 {strides = array<i32>} : memref<1x4x8x8xbf16, #tpu.memory_space<vmem>>, vector<1x1x8x8xbf16>,
    %c0_31 = arith.constant 0 : index
    %c8_32 = arith.constant 8 : index
    %53 = vector.load %arg22[%c0_31, %c8_32] : memref<8x32xf32, #tpu.memory_space<vmem>>, vector<8x8xf32>
    tpu.vector_store %arg22[%c0_31, %c8_32], %48 {strides = array<i32>} : memref<8x32xf32, #tpu.memory_space<vmem>>, vector<8x8xf32>,
    %54 = vector.extract_strided_slice %11 {offsets = [0, 16], sizes = [8, 8], strides = [1, 1]} : vector<8x32xbf16> to vector<8x8xbf16>
    %c0_33 = arith.constant 0 : index
    %c16 = arith.constant 16 : index
    %55 = vector.load %arg20[%c0_33, %c16] : memref<8x32xbf16, #tpu.memory_space<vmem>>, vector<8x8xbf16>
    %c0_34 = arith.constant 0 : index
    %c16_35 = arith.constant 16 : index
    %56 = vector.load %arg21[%c0_34, %c16_35] : memref<8x32xbf16, #tpu.memory_space<vmem>>, vector<8x8xbf16>
    %cst_36 = arith.constant dense<0.000000e+00> : vector<8x8xf32>
    %57 = tpu.matmul %54, %55, %cst_36 {dimension_numbers = #tpu.dot_dimension_numbers<[1], [1], [0], [0], [0, 0, 1, 0], [], []>} : vector<8x8xbf16>, vector<8x8xbf16>, vector<8x8xf32> -> vector<8x8xf32>
    %cst_37 = arith.constant dense<0xFF800000> : vector<8xf32>
    %58 = vector.multi_reduction <maximumf>, %57, %cst_37 [1] : vector<8x8xf32> to vector<8xf32>
    %59 = vector.shape_cast %58 : vector<8xf32> to vector<8x1xf32>
    %60 = vector.broadcast %59 : vector<8x1xf32> to vector<8x8xf32>
    %61 = arith.subf %57, %60 : vector<8x8xf32>
    %62 = math.exp %61 : vector<8x8xf32>
    %cst_38 = arith.constant dense<0.000000e+00> : vector<8xf32>
    %63 = vector.multi_reduction <add>, %62, %cst_38 [1] : vector<8x8xf32> to vector<8xf32>
    %64 = vector.shape_cast %63 : vector<8xf32> to vector<8x1xf32>
    %65 = tpu.reciprocal %64 {approx = true} : vector<8x1xf32> -> vector<8x1xf32>
    %66 = vector.broadcast %65 : vector<8x1xf32> to vector<8x8xf32>
    %67 = arith.mulf %62, %66 : vector<8x8xf32>
    %68 = arith.truncf %67 : vector<8x8xf32> to vector<8x8xbf16>
    %cst_39 = arith.constant dense<0.000000e+00> : vector<8x8xf32>
    %69 = tpu.matmul %68, %56, %cst_39 {dimension_numbers = #tpu.dot_dimension_numbers<[1], [0], [0], [1], [0, 0, 1, 1], [], []>} : vector<8x8xbf16>, vector<8x8xbf16>, vector<8x8xf32> -> vector<8x8xf32>
    %70 = arith.truncf %67 : vector<8x8xf32> to vector<8x8xbf16>
    %c0_40 = arith.constant 0 : index
    %c2 = arith.constant 2 : index
    %c0_41 = arith.constant 0 : index
    %c0_42 = arith.constant 0 : index
    %71 = vector.load %arg19[%c0_40, %c2, %c0_41, %c0_42] : memref<1x4x8x8xbf16, #tpu.memory_space<vmem>>, vector<1x1x8x8xbf16>
    %72 = vector.shape_cast %71 : vector<1x1x8x8xbf16> to vector<8x8xbf16>
    %73 = vector.shape_cast %70 : vector<8x8xbf16> to vector<1x1x8x8xbf16>
    tpu.vector_store %arg19[%c0_40, %c2, %c0_41, %c0_42], %73 {strides = array<i32>} : memref<1x4x8x8xbf16, #tpu.memory_space<vmem>>, vector<1x1x8x8xbf16>,
    %c0_43 = arith.constant 0 : index
    %c16_44 = arith.constant 16 : index
    %74 = vector.load %arg22[%c0_43, %c16_44] : memref<8x32xf32, #tpu.memory_space<vmem>>, vector<8x8xf32>
    tpu.vector_store %arg22[%c0_43, %c16_44], %69 {strides = array<i32>} : memref<8x32xf32, #tpu.memory_space<vmem>>, vector<8x8xf32>,
    %75 = vector.extract_strided_slice %11 {offsets = [0, 24], sizes = [8, 8], strides = [1, 1]} : vector<8x32xbf16> to vector<8x8xbf16>
    %c0_45 = arith.constant 0 : index
    %c24 = arith.constant 24 : index
    %76 = vector.load %arg20[%c0_45, %c24] : memref<8x32xbf16, #tpu.memory_space<vmem>>, vector<8x8xbf16>
    %c0_46 = arith.constant 0 : index
    %c24_47 = arith.constant 24 : index
    %77 = vector.load %arg21[%c0_46, %c24_47] : memref<8x32xbf16, #tpu.memory_space<vmem>>, vector<8x8xbf16>
    %cst_48 = arith.constant dense<0.000000e+00> : vector<8x8xf32>
    %78 = tpu.matmul %75, %76, %cst_48 {dimension_numbers = #tpu.dot_dimension_numbers<[1], [1], [0], [0], [0, 0, 1, 0], [], []>} : vector<8x8xbf16>, vector<8x8xbf16>, vector<8x8xf32> -> vector<8x8xf32>
    %cst_49 = arith.constant dense<0xFF800000> : vector<8xf32>
    %79 = vector.multi_reduction <maximumf>, %78, %cst_49 [1] : vector<8x8xf32> to vector<8xf32>
    %80 = vector.shape_cast %79 : vector<8xf32> to vector<8x1xf32>
    %81 = vector.broadcast %80 : vector<8x1xf32> to vector<8x8xf32>
    %82 = arith.subf %78, %81 : vector<8x8xf32>
    %83 = math.exp %82 : vector<8x8xf32>
    %cst_50 = arith.constant dense<0.000000e+00> : vector<8xf32>
    %84 = vector.multi_reduction <add>, %83, %cst_50 [1] : vector<8x8xf32> to vector<8xf32>
    %85 = vector.shape_cast %84 : vector<8xf32> to vector<8x1xf32>
    %86 = tpu.reciprocal %85 {approx = true} : vector<8x1xf32> -> vector<8x1xf32>
    %87 = vector.broadcast %86 : vector<8x1xf32> to vector<8x8xf32>
    %88 = arith.mulf %83, %87 : vector<8x8xf32>
    %89 = arith.truncf %88 : vector<8x8xf32> to vector<8x8xbf16>
    %cst_51 = arith.constant dense<0.000000e+00> : vector<8x8xf32>
    %90 = tpu.matmul %89, %77, %cst_51 {dimension_numbers = #tpu.dot_dimension_numbers<[1], [0], [0], [1], [0, 0, 1, 1], [], []>} : vector<8x8xbf16>, vector<8x8xbf16>, vector<8x8xf32> -> vector<8x8xf32>
    %91 = arith.truncf %88 : vector<8x8xf32> to vector<8x8xbf16>
    %c0_52 = arith.constant 0 : index
    %c3 = arith.constant 3 : index
    %c0_53 = arith.constant 0 : index
    %c0_54 = arith.constant 0 : index
    %92 = vector.load %arg19[%c0_52, %c3, %c0_53, %c0_54] : memref<1x4x8x8xbf16, #tpu.memory_space<vmem>>, vector<1x1x8x8xbf16>
    %93 = vector.shape_cast %92 : vector<1x1x8x8xbf16> to vector<8x8xbf16>
    %94 = vector.shape_cast %91 : vector<8x8xbf16> to vector<1x1x8x8xbf16>
    tpu.vector_store %arg19[%c0_52, %c3, %c0_53, %c0_54], %94 {strides = array<i32>} : memref<1x4x8x8xbf16, #tpu.memory_space<vmem>>, vector<1x1x8x8xbf16>,
    %c0_55 = arith.constant 0 : index
    %c24_56 = arith.constant 24 : index
    %95 = vector.load %arg22[%c0_55, %c24_56] : memref<8x32xf32, #tpu.memory_space<vmem>>, vector<8x8xf32>
    tpu.vector_store %arg22[%c0_55, %c24_56], %90 {strides = array<i32>} : memref<8x32xf32, #tpu.memory_space<vmem>>, vector<8x8xf32>,
    %c0_57 = arith.constant 0 : index
    %c0_58 = arith.constant 0 : index
    %96 = vector.load %arg22[%c0_57, %c0_58] : memref<8x32xf32, #tpu.memory_space<vmem>>, vector<8x32xf32>
    %97 = arith.addf %1, %96 : vector<8x32xf32>
    %c0_59 = arith.constant 0 : index
    %c0_60 = arith.constant 0 : index
    %98 = vector.load %arg10[%c0_59, %c0_60] : memref<1x32xf32, #tpu.memory_space<vmem>>, vector<1x32xf32>
    %c0_61 = arith.constant 0 : index
    %c0_62 = arith.constant 0 : index
    %99 = vector.load %arg11[%c0_61, %c0_62] : memref<1x32xf32, #tpu.memory_space<vmem>>, vector<1x32xf32>
    %cst_63 = arith.constant dense<0.000000e+00> : vector<8xf32>
    %100 = vector.multi_reduction <add>, %97, %cst_63 [1] : vector<8x32xf32> to vector<8xf32>
    %101 = vector.shape_cast %100 : vector<8xf32> to vector<8x1xf32>
    %cst_64 = arith.constant 3.200000e+01 : f32
    %102 = vector.broadcast %cst_64 : f32 to vector<8x1xf32>
    %103 = arith.divf %101, %102 : vector<8x1xf32>
    %104 = vector.broadcast %103 : vector<8x1xf32> to vector<8x32xf32>
    %105 = arith.subf %97, %104 : vector<8x32xf32>
    %106 = arith.mulf %105, %105 : vector<8x32xf32>
    %cst_65 = arith.constant dense<0.000000e+00> : vector<8xf32>
    %107 = vector.multi_reduction <add>, %106, %cst_65 [1] : vector<8x32xf32> to vector<8xf32>
    %108 = vector.shape_cast %107 : vector<8xf32> to vector<8x1xf32>
    %cst_66 = arith.constant 3.200000e+01 : f32
    %109 = vector.broadcast %cst_66 : f32 to vector<8x1xf32>
    %110 = arith.divf %108, %109 : vector<8x1xf32>
    %cst_67 = arith.constant 9.99999974E-6 : f32
    %111 = vector.broadcast %cst_67 : f32 to vector<8x1xf32>
    %112 = arith.addf %110, %111 : vector<8x1xf32>
    %113 = math.rsqrt %112 : vector<8x1xf32>
    %114 = vector.broadcast %113 : vector<8x1xf32> to vector<8x32xf32>
    %115 = arith.mulf %105, %114 : vector<8x32xf32>
    %116 = vector.broadcast %98 : vector<1x32xf32> to vector<8x32xf32>
    %117 = arith.mulf %115, %116 : vector<8x32xf32>
    %118 = vector.broadcast %99 : vector<1x32xf32> to vector<8x32xf32>
    %119 = arith.addf %117, %118 : vector<8x32xf32>
    %120 = arith.truncf %119 : vector<8x32xf32> to vector<8x32xbf16>
    %cst_68 = arith.constant 0.000000e+00 : f32
    %121 = vector.broadcast %cst_68 : f32 to vector<8x32xf32>
    %c0_69 = arith.constant 0 : index
    %c0_70 = arith.constant 0 : index
    %122 = vector.load %arg12[%c0_69, %c0_70] : memref<32x64xbf16, #tpu.memory_space<vmem>>, vector<32x64xbf16>
    %cst_71 = arith.constant dense<0.000000e+00> : vector<8x64xf32>
    %123 = tpu.matmul %120, %122, %cst_71 {dimension_numbers = #tpu.dot_dimension_numbers<[1], [0], [0], [1], [0, 0, 1, 1], [], []>} : vector<8x32xbf16>, vector<32x64xbf16>, vector<8x64xf32> -> vector<8x64xf32>
    %c0_72 = arith.constant 0 : index
    %c0_73 = arith.constant 0 : index
    %124 = vector.load %arg13[%c0_72, %c0_73] : memref<1x64xf32, #tpu.memory_space<vmem>>, vector<1x64xf32>
    %125 = vector.broadcast %124 : vector<1x64xf32> to vector<8x64xf32>
    %126 = arith.addf %123, %125 : vector<8x64xf32>
    %cst_74 = arith.constant 0.000000e+00 : f32
    %127 = vector.broadcast %cst_74 : f32 to vector<8x64xf32>
    %128 = arith.maximumf %126, %127 : vector<8x64xf32>
    %129 = arith.truncf %128 : vector<8x64xf32> to vector<8x64xbf16>
    %c0_75 = arith.constant 0 : index
    %c0_76 = arith.constant 0 : index
    %130 = vector.load %arg14[%c0_75, %c0_76] : memref<64x32xbf16, #tpu.memory_space<vmem>>, vector<64x32xbf16>
    %cst_77 = arith.constant dense<0.000000e+00> : vector<8x32xf32>
    %131 = tpu.matmul %129, %130, %cst_77 {dimension_numbers = #tpu.dot_dimension_numbers<[1], [0], [0], [1], [0, 0, 1, 1], [], []>} : vector<8x64xbf16>, vector<64x32xbf16>, vector<8x32xf32> -> vector<8x32xf32>
    %132 = arith.addf %121, %131 : vector<8x32xf32>
    %c0_78 = arith.constant 0 : index
    %c0_79 = arith.constant 0 : index
    %133 = vector.load %arg15[%c0_78, %c0_79] : memref<1x32xf32, #tpu.memory_space<vmem>>, vector<1x32xf32>
    %134 = vector.broadcast %133 : vector<1x32xf32> to vector<8x32xf32>
    %135 = arith.addf %132, %134 : vector<8x32xf32>
    %136 = arith.addf %119, %135 : vector<8x32xf32>
    %c0_80 = arith.constant 0 : index
    %c0_81 = arith.constant 0 : index
    %137 = vector.load %arg16[%c0_80, %c0_81] : memref<1x32xf32, #tpu.memory_space<vmem>>, vector<1x32xf32>
    %c0_82 = arith.constant 0 : index
    %c0_83 = arith.constant 0 : index
    %138 = vector.load %arg17[%c0_82, %c0_83] : memref<1x32xf32, #tpu.memory_space<vmem>>, vector<1x32xf32>
    %cst_84 = arith.constant dense<0.000000e+00> : vector<8xf32>
    %139 = vector.multi_reduction <add>, %136, %cst_84 [1] : vector<8x32xf32> to vector<8xf32>
    %140 = vector.shape_cast %139 : vector<8xf32> to vector<8x1xf32>
    %cst_85 = arith.constant 3.200000e+01 : f32
    %141 = vector.broadcast %cst_85 : f32 to vector<8x1xf32>
    %142 = arith.divf %140, %141 : vector<8x1xf32>
    %143 = vector.broadcast %142 : vector<8x1xf32> to vector<8x32xf32>
    %144 = arith.subf %136, %143 : vector<8x32xf32>
    %145 = arith.mulf %144, %144 : vector<8x32xf32>
    %cst_86 = arith.constant dense<0.000000e+00> : vector<8xf32>
    %146 = vector.multi_reduction <add>, %145, %cst_86 [1] : vector<8x32xf32> to vector<8xf32>
    %147 = vector.shape_cast %146 : vector<8xf32> to vector<8x1xf32>
    %cst_87 = arith.constant 3.200000e+01 : f32
    %148 = vector.broadcast %cst_87 : f32 to vector<8x1xf32>
    %149 = arith.divf %147, %148 : vector<8x1xf32>
    %cst_88 = arith.constant 9.99999974E-6 : f32
    %150 = vector.broadcast %cst_88 : f32 to vector<8x1xf32>
    %151 = arith.addf %149, %150 : vector<8x1xf32>
    %152 = math.rsqrt %151 : vector<8x1xf32>
    %153 = vector.broadcast %152 : vector<8x1xf32> to vector<8x32xf32>
    %154 = arith.mulf %144, %153 : vector<8x32xf32>
    %155 = vector.broadcast %137 : vector<1x32xf32> to vector<8x32xf32>
    %156 = arith.mulf %154, %155 : vector<8x32xf32>
    %157 = vector.broadcast %138 : vector<1x32xf32> to vector<8x32xf32>
    %158 = arith.addf %156, %157 : vector<8x32xf32>
    %c0_89 = arith.constant 0 : index
    %c0_90 = arith.constant 0 : index
    %c0_91 = arith.constant 0 : index
    %159 = vector.load %arg18[%c0_89, %c0_90, %c0_91] : memref<1x8x32xf32, #tpu.memory_space<vmem>>, vector<1x8x32xf32>
    %160 = vector.shape_cast %159 : vector<1x8x32xf32> to vector<8x32xf32>
    %161 = vector.shape_cast %158 : vector<8x32xf32> to vector<1x8x32xf32>
    tpu.vector_store %arg18[%c0_89, %c0_90, %c0_91], %161 {strides = array<i32>} : memref<1x8x32xf32, #tpu.memory_space<vmem>>, vector<1x8x32xf32>,
    return
  }
  func.func @transform_0(%arg0: i32, %arg1: i32) -> (i32, i32, i32) {
    %c0_i32 = arith.constant 0 : i32
    %c0_i32_0 = arith.constant 0 : i32
    %c0_i32_1 = arith.constant 0 : i32
    return %arg0, %c0_i32, %c0_i32_0 : i32, i32, i32
  }
  func.func @transform_1(%arg0: i32, %arg1: i32) -> (i32, i32, i32) {
    %c0_i32 = arith.constant 0 : i32
    %c0_i32_0 = arith.constant 0 : i32
    return %arg0, %arg1, %c0_i32 : i32, i32, i32
  }
  func.func @transform_2(%arg0: i32, %arg1: i32) -> (i32, i32) {
    %c0_i32 = arith.constant 0 : i32
    %c0_i32_0 = arith.constant 0 : i32
    %c0_i32_1 = arith.constant 0 : i32
    return %c0_i32, %c0_i32_0 : i32, i32
  }
  func.func @transform_3(%arg0: i32, %arg1: i32) -> (i32, i32) {
    %c0_i32 = arith.constant 0 : i32
    %c0_i32_0 = arith.constant 0 : i32
    %c0_i32_1 = arith.constant 0 : i32
    return %c0_i32, %c0_i32_0 : i32, i32
  }
  func.func @transform_4(%arg0: i32, %arg1: i32) -> (i32, i32) {
    %c0_i32 = arith.constant 0 : i32
    %c0_i32_0 = arith.constant 0 : i32
    %c0_i32_1 = arith.constant 0 : i32
    return %c0_i32, %c0_i32_0 : i32, i32
  }
  func.func @transform_5(%arg0: i32, %arg1: i32) -> (i32, i32) {
    %c0_i32 = arith.constant 0 : i32
    %c0_i32_0 = arith.constant 0 : i32
    %c0_i32_1 = arith.constant 0 : i32
    return %c0_i32, %c0_i32_0 : i32, i32
  }
  func.func @transform_6(%arg0: i32, %arg1: i32) -> (i32, i32) {
    %c0_i32 = arith.constant 0 : i32
    %c0_i32_0 = arith.constant 0 : i32
    %c0_i32_1 = arith.constant 0 : i32
    return %c0_i32, %c0_i32_0 : i32, i32
  }
  func.func @transform_7(%arg0: i32, %arg1: i32) -> (i32, i32) {
    %c0_i32 = arith.constant 0 : i32
    %c0_i32_0 = arith.constant 0 : i32
    %c0_i32_1 = arith.constant 0 : i32
    return %c0_i32, %c0_i32_0 : i32, i32
  }
  func.func @transform_8(%arg0: i32, %arg1: i32) -> (i32, i32) {
    %c0_i32 = arith.constant 0 : i32
    %c0_i32_0 = arith.constant 0 : i32
    %c0_i32_1 = arith.constant 0 : i32
    return %c0_i32, %c0_i32_0 : i32, i32
  }
  func.func @transform_9(%arg0: i32, %arg1: i32) -> (i32, i32) {
    %c0_i32 = arith.constant 0 : i32
    %c0_i32_0 = arith.constant 0 : i32
    %c0_i32_1 = arith.constant 0 : i32
    return %c0_i32, %c0_i32_0 : i32, i32
  }
  func.func @transform_10(%arg0: i32, %arg1: i32) -> (i32, i32) {
    %c0_i32 = arith.constant 0 : i32
    %c0_i32_0 = arith.constant 0 : i32
    %c0_i32_1 = arith.constant 0 : i32
    return %c0_i32, %c0_i32_0 : i32, i32
  }
  func.func @transform_11(%arg0: i32, %arg1: i32) -> (i32, i32) {
    %c0_i32 = arith.constant 0 : i32
    %c0_i32_0 = arith.constant 0 : i32
    %c0_i32_1 = arith.constant 0 : i32
    return %c0_i32, %c0_i32_0 : i32, i32
  }
  func.func @transform_12(%arg0: i32, %arg1: i32) -> (i32, i32) {
    %c0_i32 = arith.constant 0 : i32
    %c0_i32_0 = arith.constant 0 : i32
    %c0_i32_1 = arith.constant 0 : i32
    return %c0_i32, %c0_i32_0 : i32, i32
  }
  func.func @transform_13(%arg0: i32, %arg1: i32) -> (i32, i32) {
    %c0_i32 = arith.constant 0 : i32
    %c0_i32_0 = arith.constant 0 : i32
    %c0_i32_1 = arith.constant 0 : i32
    return %c0_i32, %c0_i32_0 : i32, i32
  }
  func.func @transform_14(%arg0: i32, %arg1: i32) -> (i32, i32) {
    %c0_i32 = arith.constant 0 : i32
    %c0_i32_0 = arith.constant 0 : i32
    %c0_i32_1 = arith.constant 0 : i32
    return %c0_i32, %c0_i32_0 : i32, i32
  }
  func.func @transform_15(%arg0: i32, %arg1: i32) -> (i32, i32) {
    %c0_i32 = arith.constant 0 : i32
    %c0_i32_0 = arith.constant 0 : i32
    %c0_i32_1 = arith.constant 0 : i32
    return %c0_i32, %c0_i32_0 : i32, i32
  }
  func.func @transform_16(%arg0: i32, %arg1: i32) -> (i32, i32, i32) {
    %c0_i32 = arith.constant 0 : i32
    %c0_i32_0 = arith.constant 0 : i32
    return %arg0, %arg1, %c0_i32 : i32, i32, i32
  }
  func.func @transform_17(%arg0: i32, %arg1: i32) -> (i32, i32, i32, i32) {
    %c0_i32 = arith.constant 0 : i32
    %c0_i32_0 = arith.constant 0 : i32
    %c0_i32_1 = arith.constant 0 : i32
    return %arg0, %c0_i32, %arg1, %c0_i32_0 : i32, i32, i32, i32
  }
}

module attributes {stable_mosaic.version = 11 : i64} {
  func.func @transformer_block_kernel(%arg0: i32, %arg1: i32, %arg2: memref<1x8x32xbf16, #tpu.memory_space<vmem>>, %arg3: memref<1x8x32xf32, #tpu.memory_space<vmem>>, %arg4: memref<32x32xbf16, #tpu.memory_space<vmem>>, %arg5: memref<1x32xf32, #tpu.memory_space<vmem>>, %arg6: memref<32x32xbf16, #tpu.memory_space<vmem>>, %arg7: memref<1x32xf32, #tpu.memory_space<vmem>>, %arg8: memref<32x32xbf16, #tpu.memory_space<vmem>>, %arg9: memref<1x32xf32, #tpu.memory_space<vmem>>, %arg10: memref<1x32xf32, #tpu.memory_space<vmem>>, %arg11: memref<1x32xf32, #tpu.memory_space<vmem>>, %arg12: memref<32x64xbf16, #tpu.memory_space<vmem>>, %arg13: memref<1x64xf32, #tpu.memory_space<vmem>>, %arg14: memref<64x32xbf16, #tpu.memory_space<vmem>>, %arg15: memref<1x32xf32, #tpu.memory_space<vmem>>, %arg16: memref<1x32xf32, #tpu.memory_space<vmem>>, %arg17: memref<1x32xf32, #tpu.memory_space<vmem>>, %arg18: memref<1x8x32xf32, #tpu.memory_space<vmem>>, %arg19: memref<1x4x8x8xbf16, #tpu.memory_space<vmem>>, %arg20: memref<8x32xbf16, #tpu.memory_space<vmem>>, %arg21: memref<8x32xbf16, #tpu.memory_space<vmem>>, %arg22: memref<8x32xf32, #tpu.memory_space<vmem>>) attributes {dimension_semantics = [#tpu.dimension_semantics<parallel>, #tpu.dimension_semantics<arbitrary>], iteration_bounds = array<i64: 2, 1>, scalar_prefetch = 0 : i64, scratch_operands = 3 : i64, tpu.core_type = #tpu.core_type<tc>, window_params = [{transform_indices = @transform_0, window_bounds = array<i64: 1, 8, 32>}, {transform_indices = @transform_1, window_bounds = array<i64: 1, 8, 32>}, {pipeline_mode = #tpu.pipeline_mode<synchronous>, transform_indices = @transform_2, window_bounds = array<i64: 32, 32>}, {pipeline_mode = #tpu.pipeline_mode<synchronous>, transform_indices = @transform_3, window_bounds = array<i64: 1, 32>}, {pipeline_mode = #tpu.pipeline_mode<synchronous>, transform_indices = @transform_4, window_bounds = array<i64: 32, 32>}, {pipeline_mode = #tpu.pipeline_mode<synchronous>, transform_indices = @transform_5, window_bounds = array<i64: 1, 32>}, {pipeline_mode = #tpu.pipeline_mode<synchronous>, transform_indices = @transform_6, window_bounds = array<i64: 32, 32>}, {pipeline_mode = #tpu.pipeline_mode<synchronous>, transform_indices = @transform_7, window_bounds = array<i64: 1, 32>}, {pipeline_mode = #tpu.pipeline_mode<synchronous>, transform_indices = @transform_8, window_bounds = array<i64: 1, 32>}, {pipeline_mode = #tpu.pipeline_mode<synchronous>, transform_indices = @transform_9, window_bounds = array<i64: 1, 32>}, {pipeline_mode = #tpu.pipeline_mode<synchronous>, transform_indices = @transform_10, window_bounds = array<i64: 32, 64>}, {pipeline_mode = #tpu.pipeline_mode<synchronous>, transform_indices = @transform_11, window_bounds = array<i64: 1, 64>}, {pipeline_mode = #tpu.pipeline_mode<synchronous>, transform_indices = @transform_12, window_bounds = array<i64: 64, 32>}, {pipeline_mode = #tpu.pipeline_mode<synchronous>, transform_indices = @transform_13, window_bounds = array<i64: 1, 32>}, {pipeline_mode = #tpu.pipeline_mode<synchronous>, transform_indices = @transform_14, window_bounds = array<i64: 1, 32>}, {pipeline_mode = #tpu.pipeline_mode<synchronous>, transform_indices = @transform_15, window_bounds = array<i64: 1, 32>}, {transform_indices = @transform_16, window_bounds = array<i64: 1, 8, 32>}, {transform_indices = @transform_17, window_bounds = array<i64: 1, 4, 8, 8>}]} {
    %c0 = arith.constant 0 : index
    %c0_0 = arith.constant 0 : index
    %c0_1 = arith.constant 0 : index
    %0 = vector.load %arg3[%c0, %c0_0, %c0_1] : memref<1x8x32xf32, #tpu.memory_space<vmem>>, vector<1x8x32xf32>
    %1 = vector.shape_cast %0 : vector<1x8x32xf32> to vector<8x32xf32>
    %2 = arith.truncf %1 : vector<8x32xf32> to vector<8x32xbf16>
    %c0_i32 = arith.constant 0 : i32
    %3 = arith.cmpi eq, %arg1, %c0_i32 : i32
    %4 = arith.extui %3 : i1 to i32
    %c0_i32_2 = arith.constant 0 : i32
    %5 = arith.cmpi ne, %4, %c0_i32_2 : i32
    scf.if %5 {
      %c0_92 = arith.constant 0 : index
      %c0_93 = arith.constant 0 : index
      %c0_94 = arith.constant 0 : index
      %162 = vector.load %arg2[%c0_92, %c0_93, %c0_94] : memref<1x8x32xbf16, #tpu.memory_space<vmem>>, vector<1x8x32xbf16>
      %163 = vector.shape_cast %162 : vector<1x8x32xbf16> to vector<8x32xbf16>
      %c0_95 = arith.constant 0 : index
      %c0_96 = arith.constant 0 : index
      %164 = vector.load %arg6[%c0_95, %c0_96] : memref<32x32xbf16, #tpu.memory_space<vmem>>, vector<32x32xbf16>
      %cst_97 = arith.constant dense<0.000000e+00> : vector<8x32xf32>
      %165 = tpu.matmul %163, %164, %cst_97 {dimension_numbers = #tpu.dot_dimension_numbers<[1], [0], [0], [1], [0, 0, 1, 1], [], []>} : vector<8x32xbf16>, vector<32x32xbf16>, vector<8x32xf32> -> vector<8x32xf32>
      %c0_98 = arith.constant 0 : index
      %c0_99 = arith.constant 0 : index
      %166 = vector.load %arg7[%c0_98, %c0_99] : memref<1x32xf32, #tpu.memory_space<vmem>>, vector<1x32xf32>
      %167 = vector.broadcast %166 : vector<1x32xf32> to vector<8x32xf32>
      %168 = arith.addf %165, %167 : vector<8x32xf32>
      %169 = arith.truncf %168 : vector<8x32xf32> to vector<8x32xbf16>
      %c0_100 = arith.constant 0 : index
      %c0_101 = arith.constant 0 : index
      %170 = vector.load %arg20[%c0_100, %c0_101] : memref<8x32xbf16, #tpu.memory_space<vmem>>, vector<8x32xbf16>
      tpu.vector_store %arg20[%c0_100, %c0_101], %169 {strides = array<i32>} : memref<8x32xbf16, #tpu.memory_space<vmem>>, vector<8x32xbf16>,
      %c0_102 = arith.constant 0 : index
      %c0_103 = arith.constant 0 : index
      %171 = vector.load %arg8[%c0_102, %c0_103] : memref<32x32xbf16, #tpu.memory_space<vmem>>, vector<32x32xbf16>
      %cst_104 = arith.constant dense<0.000000e+00> : vector<8x32xf32>
      %172 = tpu.matmul %163, %171, %cst_104 {dimension_numbers = #tpu.dot_dimension_numbers<[1], [0], [0], [1], [0, 0, 1, 1], [], []>} : vector<8x32xbf16>, vector<32x32xbf16>, vector<8x32xf32> -> vector<8x32xf32>
      %c0_105 = arith.constant 0 : index
      %c0_106 = arith.constant 0 : index
      %173 = vector.load %arg9[%c0_105, %c0_106] : memref<1x32xf32, #tpu.memory_space<vmem>>, vector<1x32xf32>
      %174 = vector.broadcast %173 : vector<1x32xf32> to vector<8x32xf32>
      %175 = arith.addf %172, %174 : vector<8x32xf32>
      %176 = arith.truncf %175 : vector<8x32xf32> to vector<8x32xbf16>
      %c0_107 = arith.constant 0 : index
      %c0_108 = arith.constant 0 : index
      %177 = vector.load %arg21[%c0_107, %c0_108] : memref<8x32xbf16, #tpu.memory_space<vmem>>, vector<8x32xbf16>
      tpu.vector_store %arg21[%c0_107, %c0_108], %176 {strides = array<i32>} : memref<8x32xbf16, #tpu.memory_space<vmem>>, vector<8x32xbf16>,
    } else {
    }
    %c0_3 = arith.constant 0 : index
    %c0_4 = arith.constant 0 : index
    %6 = vector.load %arg4[%c0_3, %c0_4] : memref<32x32xbf16, #tpu.memory_space<vmem>>, vector<32x32xbf16>
    %cst = arith.constant dense<0.000000e+00> : vector<8x32xf32>
    %7 = tpu.matmul %2, %6, %cst {dimension_numbers = #tpu.dot_dimension_numbers<[1], [0], [0], [1], [0, 0, 1, 1], [], []>} : vector<8x32xbf16>, vector<32x32xbf16>, vector<8x32xf32> -> vector<8x32xf32>
    %c0_5 = arith.constant 0 : index
    %c0_6 = arith.constant 0 : index
    %8 = vector.load %arg5[%c0_5, %c0_6] : memref<1x32xf32, #tpu.memory_space<vmem>>, vector<1x32xf32>
    %9 = vector.broadcast %8 : vector<1x32xf32> to vector<8x32xf32>
    %10 = arith.addf %7, %9 : vector<8x32xf32>
    %11 = arith.truncf %10 : vector<8x32xf32> to vector<8x32xbf16>
    %12 = vector.extract_strided_slice %11 {offsets = [0, 0], sizes = [8, 8], strides = [1, 1]} : vector<8x32xbf16> to vector<8x8xbf16>
    %c0_7 = arith.constant 0 : index
    %c0_8 = arith.constant 0 : index
    %13 = vector.load %arg20[%c0_7, %c0_8] : memref<8x32xbf16, #tpu.memory_space<vmem>>, vector<8x8xbf16>
    %c0_9 = arith.constant 0 : index
    %c0_10 = arith.constant 0 : index
    %14 = vector.load %arg21[%c0_9, %c0_10] : memref<8x32xbf16, #tpu.memory_space<vmem>>, vector<8x8xbf16>
    %cst_11 = arith.constant dense<0.000000e+00> : vector<8x8xf32>
    %15 = tpu.matmul %12, %13, %cst_11 {dimension_numbers = #tpu.dot_dimension_numbers<[1], [1], [0], [0], [0, 0, 1, 0], [], []>} : vector<8x8xbf16>, vector<8x8xbf16>, vector<8x8xf32> -> vector<8x8xf32>
    %cst_12 = arith.constant dense<0xFF800000> : vector<8xf32>
    %16 = vector.multi_reduction <maximumf>, %15, %cst_12 [1] : vector<8x8xf32> to vector<8xf32>
    %17 = vector.shape_cast %16 : vector<8xf32> to vector<8x1xf32>
    %18 = vector.broadcast %17 : vector<8x1xf32> to vector<8x8xf32>
    %19 = arith.subf %15, %18 : vector<8x8xf32>
    %20 = math.exp %19 : vector<8x8xf32>
    %cst_13 = arith.constant dense<0.000000e+00> : vector<8xf32>
    %21 = vector.multi_reduction <add>, %20, %cst_13 [1] : vector<8x8xf32> to vector<8xf32>
    %22 = vector.shape_cast %21 : vector<8xf32> to vector<8x1xf32>
    %23 = tpu.reciprocal %22 {approx = true} : vector<8x1xf32> -> vector<8x1xf32>
    %24 = vector.broadcast %23 : vector<8x1xf32> to vector<8x8xf32>
    %25 = arith.mulf %20, %24 : vector<8x8xf32>
    %26 = arith.truncf %25 : vector<8x8xf32> to vector<8x8xbf16>
    %cst_14 = arith.constant dense<0.000000e+00> : vector<8x8xf32>
    %27 = tpu.matmul %26, %14, %cst_14 {dimension_numbers = #tpu.dot_dimension_numbers<[1], [0], [0], [1], [0, 0, 1, 1], [], []>} : vector<8x8xbf16>, vector<8x8xbf16>, vector<8x8xf32> -> vector<8x8xf32>
    %28 = arith.truncf %25 : vector<8x8xf32> to vector<8x8xbf16>
    %c0_15 = arith.constant 0 : index
    %c0_16 = arith.constant 0 : index
    %c0_17 = arith.constant 0 : index
    %c0_18 = arith.constant 0 : index
    %29 = vector.load %arg19[%c0_15, %c0_16, %c0_17, %c0_18] : memref<1x4x8x8xbf16, #tpu.memory_space<vmem>>, vector<1x1x8x8xbf16>
    %30 = vector.shape_cast %29 : vector<1x1x8x8xbf16> to vector<8x8xbf16>
    %31 = vector.shape_cast %28 : vector<8x8xbf16> to vector<1x1x8x8xbf16>
    tpu.vector_store %arg19[%c0_15, %c0_16, %c0_17, %c0_18], %31 {strides = array<i32>} : memref<1x4x8x8xbf16, #tpu.memory_space<vmem>>, vector<1x1x8x8xbf16>,
    %c0_19 = arith.constant 0 : index
    %c0_20 = arith.constant 0 : index
    %32 = vector.load %arg22[%c0_19, %c0_20] : memref<8x32xf32, #tpu.memory_space<vmem>>, vector<8x8xf32>
    tpu.vector_store %arg22[%c0_19, %c0_20], %27 {strides = array<i32>} : memref<8x32xf32, #tpu.memory_space<vmem>>, vector<8x8xf32>,
    %33 = vector.extract_strided_slice %11 {offsets = [0, 8], sizes = [8, 8], strides = [1, 1]} : vector<8x32xbf16> to vector<8x8xbf16>
    %c0_21 = arith.constant 0 : index
    %c8 = arith.constant 8 : index
    %34 = vector.load %arg20[%c0_21, %c8] : memref<8x32xbf16, #tpu.memory_space<vmem>>, vector<8x8xbf16>
    %c0_22 = arith.constant 0 : index
    %c8_23 = arith.constant 8 : index
    %35 = vector.load %arg21[%c0_22, %c8_23] : memref<8x32xbf16, #tpu.memory_space<vmem>>, vector<8x8xbf16>
    %cst_24 = arith.constant dense<0.000000e+00> : vector<8x8xf32>
    %36 = tpu.matmul %33, %34, %cst_24 {dimension_numbers = #tpu.dot_dimension_numbers<[1], [1], [0], [0], [0, 0, 1, 0], [], []>} : vector<8x8xbf16>, vector<8x8xbf16>, vector<8x8xf32> -> vector<8x8xf32>
    %cst_25 = arith.constant dense<0xFF800000> : vector<8xf32>
    %37 = vector.multi_reduction <maximumf>, %36, %cst_25 [1] : vector<8x8xf32> to vector<8xf32>
    %38 = vector.shape_cast %37 : vector<8xf32> to vector<8x1xf32>
    %39 = vector.broadcast %38 : vector<8x1xf32> to vector<8x8xf32>
    %40 = arith.subf %36, %39 : vector<8x8xf32>
    %41 = math.exp %40 : vector<8x8xf32>
    %cst_26 = arith.constant dense<0.000000e+00> : vector<8xf32>
    %42 = vector.multi_reduction <add>, %41, %cst_26 [1] : vector<8x8xf32> to vector<8xf32>
    %43 = vector.shape_cast %42 : vector<8xf32> to vector<8x1xf32>
    %44 = tpu.reciprocal %43 {approx = true} : vector<8x1xf32> -> vector<8x1xf32>
    %45 = vector.broadcast %44 : vector<8x1xf32> to vector<8x8xf32>
    %46 = arith.mulf %41, %45 : vector<8x8xf32>
    %47 = arith.truncf %46 : vector<8x8xf32> to vector<8x8xbf16>
    %cst_27 = arith.constant dense<0.000000e+00> : vector<8x8xf32>
    %48 = tpu.matmul %47, %35, %cst_27 {dimension_numbers = #tpu.dot_dimension_numbers<[1], [0], [0], [1], [0, 0, 1, 1], [], []>} : vector<8x8xbf16>, vector<8x8xbf16>, vector<8x8xf32> -> vector<8x8xf32>
    %49 = arith.truncf %46 : vector<8x8xf32> to vector<8x8xbf16>
    %c0_28 = arith.constant 0 : index
    %c1 = arith.constant 1 : index
    %c0_29 = arith.constant 0 : index
    %c0_30 = arith.constant 0 : index
    %50 = vector.load %arg19[%c0_28, %c1, %c0_29, %c0_30] : memref<1x4x8x8xbf16, #tpu.memory_space<vmem>>, vector<1x1x8x8xbf16>
    %51 = vector.shape_cast %50 : vector<1x1x8x8xbf16> to vector<8x8xbf16>
    %52 = vector.shape_cast %49 : vector<8x8xbf16> to vector<1x1x8x8xbf16>
    tpu.vector_store %arg19[%c0_28, %c1, %c0_29, %c0_30], %52 {strides = array<i32>} : memref<1x4x8x8xbf16, #tpu.memory_space<vmem>>, vector<1x1x8x8xbf16>,
    %c0_31 = arith.constant 0 : index
    %c8_32 = arith.constant 8 : index
    %53 = vector.load %arg22[%c0_31, %c8_32] : memref<8x32xf32, #tpu.memory_space<vmem>>, vector<8x8xf32>
    tpu.vector_store %arg22[%c0_31, %c8_32], %48 {strides = array<i32>} : memref<8x32xf32, #tpu.memory_space<vmem>>, vector<8x8xf32>,
    %54 = vector.extract_strided_slice %11 {offsets = [0, 16], sizes = [8, 8], strides = [1, 1]} : vector<8x32xbf16> to vector<8x8xbf16>
    %c0_33 = arith.constant 0 : index
    %c16 = arith.constant 16 : index
    %55 = vector.load %arg20[%c0_33, %c16] : memref<8x32xbf16, #tpu.memory_space<vmem>>, vector<8x8xbf16>
    %c0_34 = arith.constant 0 : index
    %c16_35 = arith.constant 16 : index
    %56 = vector.load %arg21[%c0_34, %c16_35] : memref<8x32xbf16, #tpu.memory_space<vmem>>, vector<8x8xbf16>
    %cst_36 = arith.constant dense<0.000000e+00> : vector<8x8xf32>
    %57 = tpu.matmul %54, %55, %cst_36 {dimension_numbers = #tpu.dot_dimension_numbers<[1], [1], [0], [0], [0, 0, 1, 0], [], []>} : vector<8x8xbf16>, vector<8x8xbf16>, vector<8x8xf32> -> vector<8x8xf32>
    %cst_37 = arith.constant dense<0xFF800000> : vector<8xf32>
    %58 = vector.multi_reduction <maximumf>, %57, %cst_37 [1] : vector<8x8xf32> to vector<8xf32>
    %59 = vector.shape_cast %58 : vector<8xf32> to vector<8x1xf32>
    %60 = vector.broadcast %59 : vector<8x1xf32> to vector<8x8xf32>
    %61 = arith.subf %57, %60 : vector<8x8xf32>
    %62 = math.exp %61 : vector<8x8xf32>
    %cst_38 = arith.constant dense<0.000000e+00> : vector<8xf32>
    %63 = vector.multi_reduction <add>, %62, %cst_38 [1] : vector<8x8xf32> to vector<8xf32>
    %64 = vector.shape_cast %63 : vector<8xf32> to vector<8x1xf32>
    %65 = tpu.reciprocal %64 {approx = true} : vector<8x1xf32> -> vector<8x1xf32>
    %66 = vector.broadcast %65 : vector<8x1xf32> to vector<8x8xf32>
    %67 = arith.mulf %62, %66 : vector<8x8xf32>
    %68 = arith.truncf %67 : vector<8x8xf32> to vector<8x8xbf16>
    %cst_39 = arith.constant dense<0.000000e+00> : vector<8x8xf32>
    %69 = tpu.matmul %68, %56, %cst_39 {dimension_numbers = #tpu.dot_dimension_numbers<[1], [0], [0], [1], [0, 0, 1, 1], [], []>} : vector<8x8xbf16>, vector<8x8xbf16>, vector<8x8xf32> -> vector<8x8xf32>
    %70 = arith.truncf %67 : vector<8x8xf32> to vector<8x8xbf16>
    %c0_40 = arith.constant 0 : index
    %c2 = arith.constant 2 : index
    %c0_41 = arith.constant 0 : index
    %c0_42 = arith.constant 0 : index
    %71 = vector.load %arg19[%c0_40, %c2, %c0_41, %c0_42] : memref<1x4x8x8xbf16, #tpu.memory_space<vmem>>, vector<1x1x8x8xbf16>
    %72 = vector.shape_cast %71 : vector<1x1x8x8xbf16> to vector<8x8xbf16>
    %73 = vector.shape_cast %70 : vector<8x8xbf16> to vector<1x1x8x8xbf16>
    tpu.vector_store %arg19[%c0_40, %c2, %c0_41, %c0_42], %73 {strides = array<i32>} : memref<1x4x8x8xbf16, #tpu.memory_space<vmem>>, vector<1x1x8x8xbf16>,
    %c0_43 = arith.constant 0 : index
    %c16_44 = arith.constant 16 : index
    %74 = vector.load %arg22[%c0_43, %c16_44] : memref<8x32xf32, #tpu.memory_space<vmem>>, vector<8x8xf32>
    tpu.vector_store %arg22[%c0_43, %c16_44], %69 {strides = array<i32>} : memref<8x32xf32, #tpu.memory_space<vmem>>, vector<8x8xf32>,
    %75 = vector.extract_strided_slice %11 {offsets = [0, 24], sizes = [8, 8], strides = [1, 1]} : vector<8x32xbf16> to vector<8x8xbf16>
    %c0_45 = arith.constant 0 : index
    %c24 = arith.constant 24 : index
    %76 = vector.load %arg20[%c0_45, %c24] : memref<8x32xbf16, #tpu.memory_space<vmem>>, vector<8x8xbf16>
    %c0_46 = arith.constant 0 : index
    %c24_47 = arith.constant 24 : index
    %77 = vector.load %arg21[%c0_46, %c24_47] : memref<8x32xbf16, #tpu.memory_space<vmem>>, vector<8x8xbf16>
    %cst_48 = arith.constant dense<0.000000e+00> : vector<8x8xf32>
    %78 = tpu.matmul %75, %76, %cst_48 {dimension_numbers = #tpu.dot_dimension_numbers<[1], [1], [0], [0], [0, 0, 1, 0], [], []>} : vector<8x8xbf16>, vector<8x8xbf16>, vector<8x8xf32> -> vector<8x8xf32>
    %cst_49 = arith.constant dense<0xFF800000> : vector<8xf32>
    %79 = vector.multi_reduction <maximumf>, %78, %cst_49 [1] : vector<8x8xf32> to vector<8xf32>
    %80 = vector.shape_cast %79 : vector<8xf32> to vector<8x1xf32>
    %81 = vector.broadcast %80 : vector<8x1xf32> to vector<8x8xf32>
    %82 = arith.subf %78, %81 : vector<8x8xf32>
    %83 = math.exp %82 : vector<8x8xf32>
    %cst_50 = arith.constant dense<0.000000e+00> : vector<8xf32>
    %84 = vector.multi_reduction <add>, %83, %cst_50 [1] : vector<8x8xf32> to vector<8xf32>
    %85 = vector.shape_cast %84 : vector<8xf32> to vector<8x1xf32>
    %86 = tpu.reciprocal %85 {approx = true} : vector<8x1xf32> -> vector<8x1xf32>
    %87 = vector.broadcast %86 : vector<8x1xf32> to vector<8x8xf32>
    %88 = arith.mulf %83, %87 : vector<8x8xf32>
    %89 = arith.truncf %88 : vector<8x8xf32> to vector<8x8xbf16>
    %cst_51 = arith.constant dense<0.000000e+00> : vector<8x8xf32>
    %90 = tpu.matmul %89, %77, %cst_51 {dimension_numbers = #tpu.dot_dimension_numbers<[1], [0], [0], [1], [0, 0, 1, 1], [], []>} : vector<8x8xbf16>, vector<8x8xbf16>, vector<8x8xf32> -> vector<8x8xf32>
    %91 = arith.truncf %88 : vector<8x8xf32> to vector<8x8xbf16>
    %c0_52 = arith.constant 0 : index
    %c3 = arith.constant 3 : index
    %c0_53 = arith.constant 0 : index
    %c0_54 = arith.constant 0 : index
    %92 = vector.load %arg19[%c0_52, %c3, %c0_53, %c0_54] : memref<1x4x8x8xbf16, #tpu.memory_space<vmem>>, vector<1x1x8x8xbf16>
    %93 = vector.shape_cast %92 : vector<1x1x8x8xbf16> to vector<8x8xbf16>
    %94 = vector.shape_cast %91 : vector<8x8xbf16> to vector<1x1x8x8xbf16>
    tpu.vector_store %arg19[%c0_52, %c3, %c0_53, %c0_54], %94 {strides = array<i32>} : memref<1x4x8x8xbf16, #tpu.memory_space<vmem>>, vector<1x1x8x8xbf16>,
    %c0_55 = arith.constant 0 : index
    %c24_56 = arith.constant 24 : index
    %95 = vector.load %arg22[%c0_55, %c24_56] : memref<8x32xf32, #tpu.memory_space<vmem>>, vector<8x8xf32>
    tpu.vector_store %arg22[%c0_55, %c24_56], %90 {strides = array<i32>} : memref<8x32xf32, #tpu.memory_space<vmem>>, vector<8x8xf32>,
    %c0_57 = arith.constant 0 : index
    %c0_58 = arith.constant 0 : index
    %96 = vector.load %arg22[%c0_57, %c0_58] : memref<8x32xf32, #tpu.memory_space<vmem>>, vector<8x32xf32>
    %97 = arith.addf %1, %96 : vector<8x32xf32>
    %c0_59 = arith.constant 0 : index
    %c0_60 = arith.constant 0 : index
    %98 = vector.load %arg10[%c0_59, %c0_60] : memref<1x32xf32, #tpu.memory_space<vmem>>, vector<1x32xf32>
    %c0_61 = arith.constant 0 : index
    %c0_62 = arith.constant 0 : index
    %99 = vector.load %arg11[%c0_61, %c0_62] : memref<1x32xf32, #tpu.memory_space<vmem>>, vector<1x32xf32>
    %cst_63 = arith.constant dense<0.000000e+00> : vector<8xf32>
    %100 = vector.multi_reduction <add>, %97, %cst_63 [1] : vector<8x32xf32> to vector<8xf32>
    %101 = vector.shape_cast %100 : vector<8xf32> to vector<8x1xf32>
    %cst_64 = arith.constant 3.200000e+01 : f32
    %102 = vector.broadcast %cst_64 : f32 to vector<8x1xf32>
    %103 = arith.divf %101, %102 : vector<8x1xf32>
    %104 = vector.broadcast %103 : vector<8x1xf32> to vector<8x32xf32>
    %105 = arith.subf %97, %104 : vector<8x32xf32>
    %106 = arith.mulf %105, %105 : vector<8x32xf32>
    %cst_65 = arith.constant dense<0.000000e+00> : vector<8xf32>
    %107 = vector.multi_reduction <add>, %106, %cst_65 [1] : vector<8x32xf32> to vector<8xf32>
    %108 = vector.shape_cast %107 : vector<8xf32> to vector<8x1xf32>
    %cst_66 = arith.constant 3.200000e+01 : f32
    %109 = vector.broadcast %cst_66 : f32 to vector<8x1xf32>
    %110 = arith.divf %108, %109 : vector<8x1xf32>
    %cst_67 = arith.constant 9.99999974E-6 : f32
    %111 = vector.broadcast %cst_67 : f32 to vector<8x1xf32>
    %112 = arith.addf %110, %111 : vector<8x1xf32>
    %113 = math.rsqrt %112 : vector<8x1xf32>
    %114 = vector.broadcast %113 : vector<8x1xf32> to vector<8x32xf32>
    %115 = arith.mulf %105, %114 : vector<8x32xf32>
    %116 = vector.broadcast %98 : vector<1x32xf32> to vector<8x32xf32>
    %117 = arith.mulf %115, %116 : vector<8x32xf32>
    %118 = vector.broadcast %99 : vector<1x32xf32> to vector<8x32xf32>
    %119 = arith.addf %117, %118 : vector<8x32xf32>
    %120 = arith.truncf %119 : vector<8x32xf32> to vector<8x32xbf16>
    %cst_68 = arith.constant 0.000000e+00 : f32
    %121 = vector.broadcast %cst_68 : f32 to vector<8x32xf32>
    %c0_69 = arith.constant 0 : index
    %c0_70 = arith.constant 0 : index
    %122 = vector.load %arg12[%c0_69, %c0_70] : memref<32x64xbf16, #tpu.memory_space<vmem>>, vector<32x64xbf16>
    %cst_71 = arith.constant dense<0.000000e+00> : vector<8x64xf32>
    %123 = tpu.matmul %120, %122, %cst_71 {dimension_numbers = #tpu.dot_dimension_numbers<[1], [0], [0], [1], [0, 0, 1, 1], [], []>} : vector<8x32xbf16>, vector<32x64xbf16>, vector<8x64xf32> -> vector<8x64xf32>
    %c0_72 = arith.constant 0 : index
    %c0_73 = arith.constant 0 : index
    %124 = vector.load %arg13[%c0_72, %c0_73] : memref<1x64xf32, #tpu.memory_space<vmem>>, vector<1x64xf32>
    %125 = vector.broadcast %124 : vector<1x64xf32> to vector<8x64xf32>
    %126 = arith.addf %123, %125 : vector<8x64xf32>
    %cst_74 = arith.constant 0.000000e+00 : f32
    %127 = vector.broadcast %cst_74 : f32 to vector<8x64xf32>
    %128 = arith.maximumf %126, %127 : vector<8x64xf32>
    %129 = arith.truncf %128 : vector<8x64xf32> to vector<8x64xbf16>
    %c0_75 = arith.constant 0 : index
    %c0_76 = arith.constant 0 : index
    %130 = vector.load %arg14[%c0_75, %c0_76] : memref<64x32xbf16, #tpu.memory_space<vmem>>, vector<64x32xbf16>
    %cst_77 = arith.constant dense<0.000000e+00> : vector<8x32xf32>
    %131 = tpu.matmul %129, %130, %cst_77 {dimension_numbers = #tpu.dot_dimension_numbers<[1], [0], [0], [1], [0, 0, 1, 1], [], []>} : vector<8x64xbf16>, vector<64x32xbf16>, vector<8x32xf32> -> vector<8x32xf32>
    %132 = arith.addf %121, %131 : vector<8x32xf32>
    %c0_78 = arith.constant 0 : index
    %c0_79 = arith.constant 0 : index
    %133 = vector.load %arg15[%c0_78, %c0_79] : memref<1x32xf32, #tpu.memory_space<vmem>>, vector<1x32xf32>
    %134 = vector.broadcast %133 : vector<1x32xf32> to vector<8x32xf32>
    %135 = arith.addf %132, %134 : vector<8x32xf32>
    %136 = arith.addf %119, %135 : vector<8x32xf32>
    %c0_80 = arith.constant 0 : index
    %c0_81 = arith.constant 0 : index
    %137 = vector.load %arg16[%c0_80, %c0_81] : memref<1x32xf32, #tpu.memory_space<vmem>>, vector<1x32xf32>
    %c0_82 = arith.constant 0 : index
    %c0_83 = arith.constant 0 : index
    %138 = vector.load %arg17[%c0_82, %c0_83] : memref<1x32xf32, #tpu.memory_space<vmem>>, vector<1x32xf32>
    %cst_84 = arith.constant dense<0.000000e+00> : vector<8xf32>
    %139 = vector.multi_reduction <add>, %136, %cst_84 [1] : vector<8x32xf32> to vector<8xf32>
    %140 = vector.shape_cast %139 : vector<8xf32> to vector<8x1xf32>
    %cst_85 = arith.constant 3.200000e+01 : f32
    %141 = vector.broadcast %cst_85 : f32 to vector<8x1xf32>
    %142 = arith.divf %140, %141 : vector<8x1xf32>
    %143 = vector.broadcast %142 : vector<8x1xf32> to vector<8x32xf32>
    %144 = arith.subf %136, %143 : vector<8x32xf32>
    %145 = arith.mulf %144, %144 : vector<8x32xf32>
    %cst_86 = arith.constant dense<0.000000e+00> : vector<8xf32>
    %146 = vector.multi_reduction <add>, %145, %cst_86 [1] : vector<8x32xf32> to vector<8xf32>
    %147 = vector.shape_cast %146 : vector<8xf32> to vector<8x1xf32>
    %cst_87 = arith.constant 3.200000e+01 : f32
    %148 = vector.broadcast %cst_87 : f32 to vector<8x1xf32>
    %149 = arith.divf %147, %148 : vector<8x1xf32>
    %cst_88 = arith.constant 9.99999974E-6 : f32
    %150 = vector.broadcast %cst_88 : f32 to vector<8x1xf32>
    %151 = arith.addf %149, %150 : vector<8x1xf32>
    %152 = math.rsqrt %151 : vector<8x1xf32>
    %153 = vector.broadcast %152 : vector<8x1xf32> to vector<8x32xf32>
    %154 = arith.mulf %144, %153 : vector<8x32xf32>
    %155 = vector.broadcast %137 : vector<1x32xf32> to vector<8x32xf32>
    %156 = arith.mulf %154, %155 : vector<8x32xf32>
    %157 = vector.broadcast %138 : vector<1x32xf32> to vector<8x32xf32>
    %158 = arith.addf %156, %157 : vector<8x32xf32>
    %c0_89 = arith.constant 0 : index
    %c0_90 = arith.constant 0 : index
    %c0_91 = arith.constant 0 : index
    %159 = vector.load %arg18[%c0_89, %c0_90, %c0_91] : memref<1x8x32xf32, #tpu.memory_space<vmem>>, vector<1x8x32xf32>
    %160 = vector.shape_cast %159 : vector<1x8x32xf32> to vector<8x32xf32>
    %161 = vector.shape_cast %158 : vector<8x32xf32> to vector<1x8x32xf32>
    tpu.vector_store %arg18[%c0_89, %c0_90, %c0_91], %161 {strides = array<i32>} : memref<1x8x32xf32, #tpu.memory_space<vmem>>, vector<1x8x32xf32>,
    return
  }
  func.func @transform_0(%arg0: i32, %arg1: i32) -> (i32, i32, i32) {
    %c0_i32 = arith.constant 0 : i32
    %c0_i32_0 = arith.constant 0 : i32
    %c0_i32_1 = arith.constant 0 : i32
    return %arg0, %c0_i32, %c0_i32_0 : i32, i32, i32
  }
  func.func @transform_1(%arg0: i32, %arg1: i32) -> (i32, i32, i32) {
    %c0_i32 = arith.constant 0 : i32
    %c0_i32_0 = arith.constant 0 : i32
    return %arg0, %arg1, %c0_i32 : i32, i32, i32
  }
  func.func @transform_2(%arg0: i32, %arg1: i32) -> (i32, i32) {
    %c0_i32 = arith.constant 0 : i32
    %c0_i32_0 = arith.constant 0 : i32
    %c0_i32_1 = arith.constant 0 : i32
    return %c0_i32, %c0_i32_0 : i32, i32
  }
  func.func @transform_3(%arg0: i32, %arg1: i32) -> (i32, i32) {
    %c0_i32 = arith.constant 0 : i32
    %c0_i32_0 = arith.constant 0 : i32
    %c0_i32_1 = arith.constant 0 : i32
    return %c0_i32, %c0_i32_0 : i32, i32
  }
  func.func @transform_4(%arg0: i32, %arg1: i32) -> (i32, i32) {
    %c0_i32 = arith.constant 0 : i32
    %c0_i32_0 = arith.constant 0 : i32
    %c0_i32_1 = arith.constant 0 : i32
    return %c0_i32, %c0_i32_0 : i32, i32
  }
  func.func @transform_5(%arg0: i32, %arg1: i32) -> (i32, i32) {
    %c0_i32 = arith.constant 0 : i32
    %c0_i32_0 = arith.constant 0 : i32
    %c0_i32_1 = arith.constant 0 : i32
    return %c0_i32, %c0_i32_0 : i32, i32
  }
  func.func @transform_6(%arg0: i32, %arg1: i32) -> (i32, i32) {
    %c0_i32 = arith.constant 0 : i32
    %c0_i32_0 = arith.constant 0 : i32
    %c0_i32_1 = arith.constant 0 : i32
    return %c0_i32, %c0_i32_0 : i32, i32
  }
  func.func @transform_7(%arg0: i32, %arg1: i32) -> (i32, i32) {
    %c0_i32 = arith.constant 0 : i32
    %c0_i32_0 = arith.constant 0 : i32
    %c0_i32_1 = arith.constant 0 : i32
    return %c0_i32, %c0_i32_0 : i32, i32
  }
  func.func @transform_8(%arg0: i32, %arg1: i32) -> (i32, i32) {
    %c0_i32 = arith.constant 0 : i32
    %c0_i32_0 = arith.constant 0 : i32
    %c0_i32_1 = arith.constant 0 : i32
    return %c0_i32, %c0_i32_0 : i32, i32
  }
  func.func @transform_9(%arg0: i32, %arg1: i32) -> (i32, i32) {
    %c0_i32 = arith.constant 0 : i32
    %c0_i32_0 = arith.constant 0 : i32
    %c0_i32_1 = arith.constant 0 : i32
    return %c0_i32, %c0_i32_0 : i32, i32
  }
  func.func @transform_10(%arg0: i32, %arg1: i32) -> (i32, i32) {
    %c0_i32 = arith.constant 0 : i32
    %c0_i32_0 = arith.constant 0 : i32
    %c0_i32_1 = arith.constant 0 : i32
    return %c0_i32, %c0_i32_0 : i32, i32
  }
  func.func @transform_11(%arg0: i32, %arg1: i32) -> (i32, i32) {
    %c0_i32 = arith.constant 0 : i32
    %c0_i32_0 = arith.constant 0 : i32
    %c0_i32_1 = arith.constant 0 : i32
    return %c0_i32, %c0_i32_0 : i32, i32
  }
  func.func @transform_12(%arg0: i32, %arg1: i32) -> (i32, i32) {
    %c0_i32 = arith.constant 0 : i32
    %c0_i32_0 = arith.constant 0 : i32
    %c0_i32_1 = arith.constant 0 : i32
    return %c0_i32, %c0_i32_0 : i32, i32
  }
  func.func @transform_13(%arg0: i32, %arg1: i32) -> (i32, i32) {
    %c0_i32 = arith.constant 0 : i32
    %c0_i32_0 = arith.constant 0 : i32
    %c0_i32_1 = arith.constant 0 : i32
    return %c0_i32, %c0_i32_0 : i32, i32
  }
  func.func @transform_14(%arg0: i32, %arg1: i32) -> (i32, i32) {
    %c0_i32 = arith.constant 0 : i32
    %c0_i32_0 = arith.constant 0 : i32
    %c0_i32_1 = arith.constant 0 : i32
    return %c0_i32, %c0_i32_0 : i32, i32
  }
  func.func @transform_15(%arg0: i32, %arg1: i32) -> (i32, i32) {
    %c0_i32 = arith.constant 0 : i32
    %c0_i32_0 = arith.constant 0 : i32
    %c0_i32_1 = arith.constant 0 : i32
    return %c0_i32, %c0_i32_0 : i32, i32
  }
  func.func @transform_16(%arg0: i32, %arg1: i32) -> (i32, i32, i32) {
    %c0_i32 = arith.constant 0 : i32
    %c0_i32_0 = arith.constant 0 : i32
    return %arg0, %arg1, %c0_i32 : i32, i32, i32
  }
  func.func @transform_17(%arg0: i32, %arg1: i32) -> (i32, i32, i32, i32) {
    %c0_i32 = arith.constant 0 : i32
    %c0_i32_0 = arith.constant 0 : i32
    %c0_i32_1 = arith.constant 0 : i32
    return %arg0, %c0_i32, %arg1, %c0_i32_0 : i32, i32, i32, i32
  }
}

</mosaic_0001>

<bundles_post_ra>
// kernel: tpu_custom_call.1
= control target key start
LH: loop header
LB: loop body
LE: loop exit
PB: predicated region body
PF: predicated region fallthrough
CT: control target
= control target key end

     0   :  { %s2232_s0 = inlined_call_operand.hbm [shape: bf16[2,8,32], index: 0, kind: input, shape index: {}]   ;;  %s2233_s1 = inlined_call_operand.vmem [shape: f32[2,8,32], index: 1, kind: input, shape index: {}]   ;;  %s2234_s2 = inlined_call_operand.vmem [shape: bf16[32,32], index: 2, kind: input, shape index: {}]   ;;  %s2235_s3 = inlined_call_operand.vmem [shape: f32[1,32], index: 3, kind: input, shape index: {}]   ;;  %s2236_s4 = inlined_call_operand.vmem [shape: bf16[32,32], index: 4, kind: input, shape index: {}]   ;;  %s2237_s5 = inlined_call_operand.vmem [shape: f32[1,32], index: 5, kind: input, shape index: {}]   ;;  %s2238_s6 = inlined_call_operand.hbm [shape: bf16[32,32], index: 6, kind: input, shape index: {}]   ;;  %s2239_s7 = inlined_call_operand.vmem [shape: f32[1,32], index: 7, kind: input, shape index: {}]   ;;  %s2240_s8 = inlined_call_operand.vmem [shape: f32[1,32], index: 8, kind: input, shape index: {}]   ;;  %s2241_s9 = inlined_call_operand.vmem [shape: f32[1,32], index: 9, kind: input, shape index: {}]   ;;  %s2242_s10 = inlined_call_operand.hbm [shape: bf16[32,64], index: 10, kind: input, shape index: {}]   ;;  %s2243_s11 = inlined_call_operand.vmem [shape: f32[1,64], index: 11, kind: input, shape index: {}]   ;;  %s2244_s12 = inlined_call_operand.vmem [shape: bf16[64,32], index: 12, kind: input, shape index: {}]   ;;  %s2245_s13 = inlined_call_operand.vmem [shape: f32[1,32], index: 13, kind: input, shape index: {}]   ;;  %s2246_s14 = inlined_call_operand.vmem [shape: f32[1,32], index: 14, kind: input, shape index: {}]   ;;  %s2247_s15 = inlined_call_operand.vmem [shape: f32[1,32], index: 15, kind: input, shape index: {}]   ;;  %s2248_s16 = inlined_call_operand.hbm [shape: f32[2,8,32], index: 16, kind: output, shape index: {0}]   ;;  %s2249_s17 = inlined_call_operand.hbm [shape: bf16[2,4,8,8], index: 17, kind: output, shape index: {1}]  }
   0x1   :  { %2256 = sst [smem:[#allocation21_spill]] %s2232_s0 }
   0x2   :  { %2257 = sst [smem:[#allocation22_spill]] %s2233_s1 }
   0x3   :  { %2258 = sst [smem:[#allocation23_spill]] %s2234_s2 }
   0x4   :  { %2259 = sst [smem:[#allocation24_spill]] %s2235_s3 }
   0x5   :  { %2260 = sst [smem:[#allocation25_spill]] %s2238_s6 }
   0x6   :  { %2261 = sst [smem:[#allocation26_spill]] %s2242_s10 }
   0x7   :  { %2262 = sst [smem:[#allocation27_spill]] %s2243_s11 }
   0x8   :  { %2263 = sst [smem:[#allocation28_spill]] %s2245_s13 }
   0x9   :  { %2264 = sst [smem:[#allocation29_spill]] %s2246_s14 }
   0xa   :  { %2265 = sst [smem:[#allocation30_spill]] %s2247_s15 }
   0xb   :  { %2266 = sst [smem:[#allocation31_spill]] %s2248_s16 }
   0xc   :  { %2267 = sst [smem:[#allocation32_spill]] %s2249_s17 }
   0xd   :  { %23 = vsyncpa [#allocation6], 0 }
   0xe   :  { %25 = vsyncpa [#allocation6 + $0x1], 0 }
   0xf   :  { %26 = vsyncpa [#allocation9], 0 }
  0x10   :  { %27 = vsyncpa [#allocation7], 0 }
  0x11   :  { %29 = vsyncpa [#allocation7 + $0x1], 0 }
  0x12   :  { %30 = vsyncpa [#allocation13], 0 }
  0x13   :  { %32 = vsyncpa [#allocation13 + $0x1], 0  ;;  %s1948_s24 = smov 0   ;;  %s1950_s25 = smov 0  }
  0x14   :  { %s1952_s26 = smov 0   ;;  %s1954_s27 = smov 0  }
  0x15   :  { %s1956_s28 = smov 0   ;;  %s1958_s29 = smov 0  }
  0x16 LB: > { %2268 = sst [smem:[#allocation18_spill]] %s1823_s24  ;;  %s2250_s0 = sadd.s32 4294967295, %s1843_s29   ;;  %s1843_s29 = sphi %s1958_s29, %s38_s29   ;;  %s1839_s28 = sphi %s1956_s28, %s2292_s28   ;;  %s1835_s27 = sphi %s1954_s27, %s2291_s27   ;;  %s1831_s26 = sphi %s1952_s26, %s2295_s26   ;;  %s1827_s25 = sphi %s1950_s25, %s2294_s25   ;;  %s1823_s24 = sphi %s1948_s24, %s2293_s24  }
  0x17   : > { %2269 = sst [smem:[#allocation19_spill]] %s1839_s28  ;;  %p1408_p0 = scmp.ge.s32.totalorder %s1843_s29, 1 }
  0x18   : > { %p1982_p1 = scmp.eq.s32.totalorder %s2250_s0, 0  ;;  %p459_p2 = scmp.lt.s32.totalorder %s1843_s29, 3 }
  0x19   : > { %s2271_s6 = sld [smem:[#allocation25_spill]]  ;;  %s1845_s21 = smov [#allocation8]  }
  0x1a   : > { %p1990_p3 = pnand %p1408_p0, %p459_p2  ;;  %s484_s22 = sshll.u32 %s1845_s21, 4  ;;  %s485_s22 = int_to_ptr.vmem [resolvable:$true] %s484_s22 }
  0x1b   : > { %p1411_p6 = scmp.ge.s32.totalorder %s1843_s29, 2  ;;  %s2273_s10 = sld [smem:[#allocation26_spill]] }
  0x1c   : > { %p1519_p4 = pneg %p1990_p3  ;;  %s1846_s0 = smov 64  }
  0x1d   : > { %s1848_s21 = smov [#allocation10]   ;;  %s50_s16 = sadd.s32 1, %s1839_s28 }
  0x1e   : > { %p1520_p5 = pnand %p1519_p4, %p1982_p1  ;;  %s507_s15 = sshll.u32 %s1848_s21, 4  ;;  %s508_s15 = int_to_ptr.vmem [resolvable:$true] %s507_s15 }
  0x1f   : > { %s482_s1 = sshll.u32 %s2271_s6, 4  ;;  %s1847_s6 = smov 4   ;;  %s483_s1 = int_to_ptr.hbm [resolvable:$true] %s482_s1 }
  0x20   : > { %1522 = dma.hbm_to_vmem [thread:$0]  (!%p1520_p5), %s483_s1, 256, %s485_s22, [#allocation9], %s1846_s0, %s1846_s0, %s1847_s6  }
  0x21   : > { %s505_s19 = sshll.u32 %s2273_s10, 4  ;;  %s1407_s14 = sadd.s32 4294967294, %s1843_s29   ;;  %s506_s19 = int_to_ptr.hbm [resolvable:$true] %s505_s19 }
  0x22   : > { %1525 = dma.hbm_to_vmem [thread:$0]  (!%p1520_p5), %s506_s19, 256, %s508_s15, [#allocation9], %s1846_s0, %s1846_s0, %s1847_s6  }
  0x23   : > { %p52_p7 = scmp.ge.s32.totalorder %s50_s16, 2  ;;  %s57_s23 = sadd.s32 1, %s1831_s26 }
  0x24   : > { %p64_p8 = scmp.ne.s32.totalorder %s1831_s26, %s1827_s25  ;;  %p65_p9 = scmp.eq.s32.totalorder %s1843_s29, 0 }
  0x25   : > { %s2297_s16 = smov (%p52_p7, %s50_s16), 0  ;;  %p70_p10 = scmp.ne.s32.totalorder %s1827_s25, %s1823_s24 }
  0x26   : > { %2274 = sst [smem:[#allocation20_spill]] %s2297_s16  ;;  %s54_s1 = ssub.s32 %s1839_s28, %s2297_s16 }
  0x27   : > { %s2275_s22 = sadd.s32 4294967295, %s1843_s29   ;;  %p55_p12 = scmp.eq.s32.totalorder %s54_s1, 0 }
  0x28   : > { %p418_p11 = scmp.eq.s32.totalorder %s2275_s22, 1  ;;  %p2018_p13 = por %p1982_p1, %p70_p10 }
  0x29   : > { %p424_p2 = scmp.eq.s32.totalorder %s1407_s14, 1  ;;  %p66_p4 = por %p65_p9, %p64_p8 }
  0x2a   : > { %p2022_p0 = por %p418_p11, %p64_p8  ;;  %s536_s19 = sand.u32 1, %s1831_s26  }
  0x2b   : > { %s2027_s0 = scalar_select %p55_p12, %s1831_s26, %s57_s23  }
  0x2c   : > { %p2029_p5 = por %p424_p2, %p70_p10  ;;  %s1413_s21 = sshll.u32 %s1839_s28, 2 }
  0x2d   : > { %p1539_p7 = scmp.lt.s32.totalorder %s1843_s29, 2  ;;  %s1412_s1 = sshll.u32 %s536_s19, 2 }
  0x2e   : > { %s2279_s16 = sld [smem:[#allocation21_spill]]  ;;  %s540_s13 = scalar_lea.vmem [#allocation5], %s1412_s1 }
  0x2f   : > { %s548_s11 = sshll.u32 %s540_s13, 4  ;;  %p1527_p11 = pnand %p1539_p7, %p66_p4  ;;  %s549_s11 = int_to_ptr.vmem [resolvable:$true] %s548_s11 }
  0x30   : > { %s537_s14 = scalar_lea.sflag [#allocation6], %s536_s19  ;;  %s2042_s23 = sand.u32 (!%p1990_p3), 1, %s1827_s25  }
  0x31   : > { %s1415_s28 = sshll.u32 (!%p1990_p3), %s2042_s23, 2  ;;  %s570_s10 = scalar_lea.sflag (!%p1990_p3), [#allocation6], %s2042_s23 }
  0x32   : > { %567 = sbr.rel (%p1990_p3) target bundleno = 1817 (0x719), region = 84 }
  0x34   : > { %s544_s24 = scalar_lea.hbm %s2279_s16, %s1413_s21  ;;  %s573_s16 = scalar_lea.vmem (!%p1990_p3), [#allocation5], %s1415_s28 }
  0x35   : > { %s546_s17 = sshll.u32 %s544_s24, 4  ;;  %s547_s17 = int_to_ptr.hbm [resolvable:$true] %s546_s17 }
  0x36   : > { %1529 = dma.hbm_to_vmem [thread:$0]  (!%p1527_p11), %s547_s17, 64, %s549_s11, %s537_s14  }
  0x37   : > { %1806 = dma.done.wait (%p2018_p13), %s570_s10, 64  }
  0x38   : > { %1808 = vsyncadd (%p2018_p13), %s570_s10, 4294967232 }
  0x39   : > { %1810 = dma.done.wait (%p1982_p1), [#allocation9], 512  }
  0x3a   : > { %1812 = vsyncadd (%p1982_p1), [#allocation9], 4294966784  ;;  %p647_p3 = scmp.lt.s32.totalorder %s1835_s27, 1  ;;  %s2280_s20 = sld [smem:[#allocation22_spill]]  ;;  %v1493_v0 = vld [vmem:[%s2236_s4 + $0x8] sm:$0xff]  ;;  %v1492_v2 = vld [vmem:[%s2236_s4] sm:$0xff] }
  0x3b   : > { %s2281_s2 = sld [smem:[#allocation23_spill]]  ;;  %692 = vmatpush.bf16.msra.mxu0 %v1493_v0  ;;  %v661_v6 = vld [vmem:[%s573_s16] sm:$0xf]  ;;  %vm682_vm0 = vcmask 261120   ;;  %v1604_v7 = vld [vmem:[%s2237_s5] ss:$0 sm:$0xff] }
  0x3c   : > { %s648_s11 = scalar_select %p647_p3, %s1835_s27, 1  ;;  %vm700_vm1 = vcmask 257024   ;;  %vm777_vm2 = vcmask 64512   ;;  %v1495_v30 = vld [vmem:[#allocation8 + $0x8] sm:$0xff]  ;;  %v1494_v31 = vld [vmem:[#allocation8] sm:$0xff]  ;;  %vm812_vm3 = vcmask 1043456  }
  0x3d   : > { %s2282_s3 = sld [smem:[#allocation24_spill]]  ;;  %s1849_s16 = smov 112   ;;  %728 = vmatpush.bf16.msra.mxu1 %v1495_v30  ;;  %v1606_v44 = vld [vmem:[%s2239_s7] ss:$0 sm:$0xff]  ;;  %vm829_vm4 = vcmask 60416   ;;  %vm905_vm5 = vcmask 130112  }
  0x3e   : > { %s1420_s13 = sshll.u32 %s648_s11, 3  ;;  %s1419_s6 = sshll.u32 %s2042_s23, 4  ;;  %vm977_vm6 = vcmask 195712   ;;  %vm1049_vm7 = vcmask 261312   ;;  %vm1167_vm12 = vcmask 523264  }
  0x3f   : > { %693 = vmatpush.bf16.msra.mxu0 %v1492_v2  ;;  %s2113_s1 = scalar_lea.vmem [#allocation12], %s1419_s6  ;;  %s1852_s22 = smov 8  }
  0x40   : > { %s653_s28 = scalar_lea.vmem %s2280_s20, %s1420_s13  ;;  %s1850_s20 = smov 120  }
  0x41   : > { %v1497_v1 = vld [vmem:[%s2281_s2 + $0x8] sm:$0xff]  ;;  %v1496_v3 = vld [vmem:[%s2281_s2] sm:$0xff]  ;;  %729 = vmatpush.bf16.msra.mxu1 %v1494_v31  ;;  %s1853_s30 = smov 24   ;;  %s1854_s14 = smov 16  }
  0x42   : > { %767 = vmatpush.bf16.msra.mxu2 %v1497_v1  ;;  %v2071_v4 = vld [vmem:[%s653_s28] sm:$0xff]  ;;  %1429 = vmatmul.msk.bf16.vlgmr.msra.gmra.mxu0 %vm682_vm0, %v661_v6  ;;  %s1851_s28 = smov 104   ;;  %s2283_s10 = sld [smem:[#allocation27_spill]] }
  0x43   : > { %v656_v5 = vpack.c.bf16 %v2071_v4, %v2071_v4  ;;  %v1605_v11 = vld [vmem:[%s2282_s3] ss:$0 sm:$0xff]  ;;  %s2284_s17 = sld [smem:[#allocation28_spill]]  ;;  %s1504_s24 = sshll.u32 %s1835_s27, 4 }
  0x44   : > { %1438 = vmatmul.msk.bf16.vlgmr.msra.gmra.mxu1 %vm682_vm0, %v661_v6  ;;  %s1252_s6 = sshll.u32 %s2113_s1, 4  ;;  %s1253_s6 = int_to_ptr.vmem [resolvable:$true] %s1252_s6 }
  0x46   : > { %768 = vmatpush.bf16.msra.mxu2 %v1496_v3 }
  0x49   : > { %1447 = vmatmul.msk.bf16.vlgmr.msra.gmra.mxu2 %vm682_vm0, %v656_v5 }
  0xbf   : > { %v695_v8 = vpop.f32.mrf.mxu0 }
  0xc0   : > { %v696_v9 = vadd.f32 %v1604_v7, %v695_v8 }
  0xc1   : > { %v731_v45 = vpop.f32.mrf.mxu1 }
  0xc2   : > { %v699_v10 = vpack.c.bf16 %v696_v9, %v696_v9  ;;  %v732_v46 = vadd.f32 %v1606_v44, %v731_v45 }
  0xc4   : > { %701 = vst.msk [vmem:[#allocation2] sm:$0xf] %vm700_vm1, %v699_v10  ;;  %v735_v47 = vpack.c.bf16 %v732_v46, %v732_v46 }
  0xc6   : > { %736 = vst.msk [vmem:[#allocation3] sm:$0xf] %vm700_vm1, %v735_v47 }
  0xc7   : > { %v697_v14 = vpop.f32.mrf.mxu0 }
  0xc9   : > { %v733_v48 = vpop.f32.mrf.mxu1 }
  0xcb   : > { %v775_v17 = vld [vmem:[#allocation2] sm:$0xf] }
  0xcc   : > { %v770_v12 = vpop.f32.mrf.mxu2  ;;  %v907_v18 = vld [vmem:[#allocation2] sm:$0xf]  ;;  %v782_v21 = vsel %vm777_vm2, %v775_v17, 0 }
  0xcd   : > { %v771_v13 = vadd.f32 %v1605_v11, %v770_v12  ;;  %v832_v19 = vld [vmem:[#allocation2] sm:$0xf]  ;;  %v912_v22 = vunpack.c.l.b16 %v907_v18  ;;  %791 = vmatpush.bf16.xpose.msra.mxu3 %v782_v21  ;;  %v776_v49 = vld [vmem:[#allocation3] sm:$0xf] }
  0xce   : > { %v840_v23 = vunpack.c.l.b16 %v832_v19  ;;  %v979_v27 = vld [vmem:[#allocation2] sm:$0xf]  ;;  %v814_v50 = vsel %vm812_vm3, %v776_v49, 0  ;;  %v833_v1 = vld [vmem:[#allocation3] sm:$0xf] }
  0xcf   : > { %v774_v15 = vpack.c.bf16 %v771_v13, %v771_v13  ;;  %v913_v25 = vpack.c.b16 %v912_v22, %v912_v22  ;;  %v984_v28 = vunpack.c.l.b16 %v979_v27  ;;  %823 = vmatpush.bf16.msrb.mxu0 %v814_v50  ;;  %v876_v2 = vunpack.c.l.b16 %v833_v1 }
  0xd0   : > { %v841_v26 = vpack.c.b16 %v840_v23, %v840_v23 }
  0xd1   : > { %v835_v16 = vunpack.c.l.b16 %v774_v15  ;;  %914 = vrot.lane.b32.xlu1 %v913_v25, %s1849_s16  ;;  %v985_v29 = vpack.c.b16 %v984_v28, %v984_v28  ;;  %v877_v3 = vpack.c.b16 %v876_v2, %v876_v2 }
  0xd2   : > { %842 = vrot.lane.b32.xlu0 %v841_v26, %s1850_s20  ;;  %v980_v26 = vld [vmem:[#allocation3] sm:$0xf] }
  0xd3   : > { %v836_v20 = vpack.c.b16 %v835_v16, %v835_v16  ;;  %v1020_v27 = vunpack.c.l.b16 %v980_v26 }
  0xd4   : > { %v772_v24 = vpop.f32.mrf.mxu2  ;;  %1448 = vmatmul.msk.bf16.vlgmr.msra.gmra.mxu3 %vm777_vm2, %v774_v15 }
  0xd5   : > { %909 = vrot.lane.b32.xlu2 %v836_v20, %s1849_s16  ;;  %v1021_v28 = vpack.c.b16 %v1020_v27, %v1020_v27 }
  0xd9   : > { %986 = vrot.lane.b32.xlu1 %v985_v29, %s1851_s28  ;;  %v908_v29 = vld [vmem:[#allocation3] sm:$0xf] }
  0xda   : > { %837 = vrot.lane.b32.xlu0 %v836_v20, %s1850_s20  ;;  %v948_v30 = vunpack.c.l.b16 %v908_v29 }
  0xdc   : > { %v949_v31 = vpack.c.b16 %v948_v30, %v948_v30  ;;  %v1501_v30 = vld [vmem:[%s2244_s12 + $0x8] sm:$0xff] }
  0xdd   : > { %981 = vrot.lane.b32.xlu2 %v836_v20, %s1851_s28 }
 0x12f   : > { %v910_v36 = vpop.permute.xlu2 %909 }
 0x137   : > { %v982_v42 = vpop.permute.xlu2 %981 }
 0x143   : > { %v915_v32 = vpop.permute.xlu1 %914 }
 0x144   : > { %v843_v33 = vpop.permute.xlu0 %842  ;;  %v920_v35 = vsel %vm777_vm2, %v915_v32, 0 }
 0x145   : > { %v848_v34 = vsel %vm777_vm2, %v843_v33, 0  ;;  %929 = vmatpush.bf16.xpose.msrb.mxu3 %v920_v35 }
 0x146   : > { %857 = vmatpush.bf16.xpose.msrb.mxu1 %v848_v34 }
 0x14b   : > { %v987_v37 = vpop.permute.xlu1 %986 }
 0x14c   : > { %v838_v38 = vpop.permute.xlu0 %837  ;;  %v992_v39 = vsel %vm777_vm2, %v987_v37, 0  ;;  %1453 = vmatmul.msk.bf16.vlgmr.msrb.gmra.mxu3 %vm777_vm2, %v910_v36 }
 0x14d   : > { %1450 = vmatmul.msk.bf16.vlgmr.msrb.gmra.mxu1 %vm777_vm2, %v838_v38 }
 0x14e   : > { %1001 = vmatpush.bf16.xpose.msra.mxu1 %v992_v39 }
 0x157   : > { %v793_v40 = vpop.f32.mrf.mxu3 }
 0x158   : > { %v797_v41 = vsel %vm777_vm2, %v793_v40, -inf }
 0x159   : > { %798 = vmax.xlane.f32.xlu1 %v797_v41 }
 0x15d   : > { %1456 = vmatmul.msk.bf16.vlgmr.msra.gmra.mxu1 %vm777_vm2, %v982_v42 }
 0x15f   : > { %v795_v43 = vpop.f32.mrf.mxu3 }
 0x1ca   : > { %v859_v51 = vpop.f32.mrf.mxu1 }
 0x1cb   : > { %v863_v52 = vsel %vm777_vm2, %v859_v51, -inf }
 0x1cc   : > { %864 = vmax.xlane.f32.xlu0 %v863_v52  ;;  %v799_v53 = vpop.xlane.xlu1 %798 }
 0x1cd   : > { %v800_v54 = vsub.f32 %v793_v40, %v799_v53 }
 0x1cf   : > { %v931_v55 = vpop.f32.mrf.mxu3  ;;  %v801_v56 = vmul.f32 1.442695, %v800_v54 }
 0x1d0   : > { %v935_v0 = vsel %vm777_vm2, %v931_v55, -inf }
 0x1d1   : > { %1613 = vpow2.f32 %v801_v56 }
 0x1d2   : > { %v861_v57 = vpop.f32.mrf.mxu1 }
 0x1d7   : > { %v933_v58 = vpop.f32.mrf.mxu3  ;;  %v1614_v59 = vpop.eup %1613 }
 0x1d8   : > { %v803_v61 = vsel %vm777_vm2, %v1614_v59, 0.0 }
 0x1d9   : > { %804 = vadd.xlane.f32.xlu1 %v803_v61 }
 0x1da   : > { %v1003_v60 = vpop.f32.mrf.mxu1 }
 0x1db   : > { %v1007_v62 = vsel %vm777_vm2, %v1003_v60, -inf }
 0x1dc   : > { %1008 = vmax.xlane.f32.xlu2 %v1007_v62  ;;  %v1855_v62 = vmov 32.0  }
 0x1e2   : > { %v1005_v63 = vpop.f32.mrf.mxu1 }
 0x1e4   : > { %936 = vmax.xlane.f32.xlu2 %v935_v0 }
 0x1fc   : > { %878 = vrot.lane.b32.xlu2 %v877_v3, %s1850_s20 }
 0x23f   : > { %v865_v5 = vpop.xlane.xlu0 %864 }
 0x240   : > { %v866_v6 = vsub.f32 %v859_v51, %v865_v5 }
 0x242   : > { %v867_v7 = vmul.f32 1.442695, %v866_v6 }
 0x244   : > { %1615 = vpow2.f32 %v867_v7 }
 0x24a   : > { %v1616_v8 = vpop.eup %1615 }
 0x24b   : > { %v869_v9 = vsel %vm777_vm2, %v1616_v8, 0.0 }
 0x24c   : > { %870 = vadd.xlane.f32.xlu0 %v869_v9  ;;  %v805_v10 = vpop.xlane.xlu1 %804 }
 0x24d   : > { %1617 = vrcp.f32 %v805_v10  ;;  %v1499_v10 = vld [vmem:[#allocation10 + $0x8] sm:$0xff] }
 0x24e   : > { %1122 = vmatpush.bf16.msra.mxu3 %v1499_v10 }
 0x24f   : > { %v1009_v11 = vpop.xlane.xlu2 %1008 }
 0x250   : > { %v1010_v12 = vsub.f32 %v1003_v60, %v1009_v11  ;;  %v1498_v11 = vld [vmem:[#allocation10] sm:$0xff] }
 0x252   : > { %v1011_v13 = vmul.f32 1.442695, %v1010_v12  ;;  %1123 = vmatpush.bf16.msra.mxu3 %v1498_v11  ;;  %v1503_v12 = vld [vmem:[%s2244_s12 + $0x18] sm:$0xff] }
 0x253   : > { %v1618_v14 = vpop.eup %1617 }
 0x254   : > { %1619 = vpow2.f32 %v1011_v13  ;;  %v807_v15 = vmul.f32 %v1618_v14, %v1614_v59 }
 0x256   : > { %v808_v18 = vpack.c.bf16 %v807_v15, %v807_v15  ;;  %v1502_v15 = vld [vmem:[%s2244_s12 + $0x10] sm:$0xff] }
 0x257   : > { %v937_v16 = vpop.xlane.xlu2 %936 }
 0x258   : > { %v938_v17 = vsub.f32 %v931_v55, %v937_v16  ;;  %1449 = vmatmul.msk.bf16.vlgmr.msrb.gmra.mxu0 %vm777_vm2, %v808_v18  ;;  %830 = vst.msk [vmem:[%s2113_s1] sm:$0xf] %vm829_vm4, %v808_v18 }
 0x25a   : > { %v1620_v19 = vpop.eup %1619  ;;  %v939_v20 = vmul.f32 1.442695, %v938_v17 }
 0x25b   : > { %v1013_v21 = vsel %vm777_vm2, %v1620_v19, 0.0 }
 0x25c   : > { %1621 = vpow2.f32 %v939_v20  ;;  %1014 = vadd.xlane.f32.xlu0 %v1013_v21 }
 0x25f   : > { %v879_v22 = vpop.permute.xlu2 %878 }
 0x260   : > { %v884_v23 = vsel %vm812_vm3, %v879_v22, 0 }
 0x261   : > { %893 = vmatpush.bf16.msrb.mxu2 %v884_v23  ;;  %v1607_v23 = vld [vmem:[%s2240_s8] ss:$0 sm:$0xff] }
 0x262   : > { %v1622_v24 = vpop.eup %1621 }
 0x263   : > { %v941_v25 = vsel %vm777_vm2, %v1622_v24, 0.0 }
 0x264   : > { %942 = vadd.xlane.f32.xlu1 %v941_v25  ;;  %v1608_v25 = vld [vmem:[%s2241_s9] ss:$0 sm:$0xff] }
 0x270   : > { %1022 = vrot.lane.b32.xlu0 %v1021_v28, %s1851_s28  ;;  %s2285_s28 = sld [smem:[#allocation32_spill]] }
 0x276   : > { %s2286_s19 = smov %s2285_s28  ;;  %s1251_s21 = scalar_lea.hbm %s2285_s28, %s1504_s24 }
 0x27d   : > { %950 = vrot.lane.b32.xlu1 %v949_v31, %s1849_s16  ;;  %v1500_v31 = vld [vmem:[%s2244_s12] sm:$0xff] }
 0x2bf   : > { %v871_v32 = vpop.xlane.xlu0 %870 }
 0x2c0   : > { %1623 = vrcp.f32 %v871_v32  ;;  %v1609_v32 = vld [vmem:[%s2283_s10] ss:$0 sm:$0xff] }
 0x2c6   : > { %v1624_v33 = vpop.eup %1623 }
 0x2c7   : > { %v873_v34 = vmul.f32 %v1624_v33, %v1616_v8 }
 0x2c9   : > { %v874_v35 = vpack.c.bf16 %v873_v34, %v873_v34 }
 0x2cb   : > { %1451 = vmatmul.msk.bf16.vlgmr.msrb.gmra.mxu2 %vm777_vm2, %v874_v35  ;;  %1452 = vst.msk [vmem:[%s2113_s1 + $0x4] sm:$0xf] %vm829_vm4, %v874_v35 }
 0x2cf   : > { %v1015_v36 = vpop.xlane.xlu0 %1014 }
 0x2d0   : > { %1625 = vrcp.f32 %v1015_v36 }
 0x2d5   : > { %v825_v39 = vpop.f32.mrf.mxu0 }
 0x2d6   : > { %v1626_v37 = vpop.eup %1625  ;;  %831 = vst.msk [vmem:[#allocation4] sm:$0xff] %vm777_vm2, %v825_v39 }
 0x2d7   : > { %v1017_v38 = vmul.f32 %v1626_v37, %v1620_v19  ;;  %v943_v40 = vpop.xlane.xlu1 %942 }
 0x2d8   : > { %1627 = vrcp.f32 %v943_v40 }
 0x2d9   : > { %v1018_v41 = vpack.c.bf16 %v1017_v38, %v1017_v38  ;;  %1629 = vrcp.f32 %v1855_v62  ;;  %v1610_v38 = vld [vmem:[%s2284_s17] ss:$0 sm:$0xff]  ;;  %s1745_s17 = scalar_lea.hbm %s2286_s19, 32 }
 0x2db   : > { %1458 = vst.msk [vmem:[%s2113_s1 + $0xc] sm:$0xf] %vm829_vm4, %v1018_v41 }
 0x2dd   : > { %v827_v44 = vpop.f32.mrf.mxu0 }
 0x2de   : > { %v1628_v42 = vpop.eup %1627 }
 0x2df   : > { %v945_v43 = vmul.f32 %v1628_v42, %v1622_v24  ;;  %v1630_v63 = vpop.eup %1629 }
 0x2e0   : > { %v1059_v0 = vmul.f32 32.0, %v1630_v63  ;;  %vm1063_vm8 = vweird.f32 %v1630_v63 }
 0x2e1   : > { %v946_v45 = vpack.c.bf16 %v945_v43, %v945_v43 }
 0x2e2   : > { %v1023_v46 = vpop.permute.xlu0 %1022  ;;  %v1060_v1 = vsub.f32 1.0, %v1059_v0 }
 0x2e3   : > { %1455 = vst.msk [vmem:[%s2113_s1 + $0x8] sm:$0xf] %vm829_vm4, %v946_v45  ;;  %v1028_v47 = vsel %vm812_vm3, %v1023_v46, 0 }
 0x2e4   : > { %1037 = vmatpush.bf16.msra.mxu2 %v1028_v47  ;;  %v1061_v2 = vmul.f32 %v1630_v63, %v1060_v1 }
 0x2e6   : > { %v1062_v3 = vadd.f32 %v1630_v63, %v1061_v2 }
 0x2e7   : > { %1457 = vmatmul.msk.bf16.vlgmr.msra.gmra.mxu2 %vm777_vm2, %v1018_v41 }
 0x2e8   : > { %v2136_v5 = vsel %vm1063_vm8, %v1630_v63, %v1062_v3 }
 0x2ef   : > { %v951_v48 = vpop.permute.xlu1 %950 }
 0x2f0   : > { %v956_v49 = vsel %vm812_vm3, %v951_v48, 0 }
 0x2f1   : > { %965 = vmatpush.bf16.msra.mxu0 %v956_v49 }
 0x2f4   : > { %1454 = vmatmul.msk.bf16.vlgmr.msra.gmra.mxu0 %vm777_vm2, %v946_v45 }
 0x2f5   : > { %1175 = vmatpush.bf16.msrb.mxu0 %v1503_v12 }
 0x2f9   : > { %1176 = vmatpush.bf16.msrb.mxu0 %v1502_v15 }
 0x2fd   : > { %1177 = vmatpush.bf16.msrb.mxu0 %v1501_v30 }
 0x301   : > { %1178 = vmatpush.bf16.msrb.mxu0 %v1500_v31 }
 0x34e   : > { %v895_v50 = vpop.f32.mrf.mxu2 }
 0x34f   : > { %902 = vrot.lane.b32.xlu2 %v895_v50, %s1852_s22  ;;  %s1254_s22 = sshll.u32 %s1251_s21, 4  ;;  %s1255_s22 = int_to_ptr.hbm [resolvable:$true] %s1254_s22 }
 0x356   : > { %v897_v51 = vpop.f32.mrf.mxu2 }
 0x36a   : > { %v1039_v52 = vpop.f32.mrf.mxu2 }
 0x36b   : > { %1046 = vrot.lane.b32.xlu2 %v1039_v52, %s1853_s30  ;;  %s1224_s30 = scalar_lea.sflag [#allocation13], %s2042_s23 }
 0x371   : > { %v967_v53 = vpop.f32.mrf.mxu0 }
 0x372   : > { %974 = vrot.lane.b32.xlu0 %v967_v53, %s1854_s14  ;;  %v1041_v54 = vpop.f32.mrf.mxu2  ;;  %s1739_s14 = sshra.s32 %s1255_s22, 4  ;;  %s1740_s14 = int_to_ptr.hbm [resolvable:$true] %s1739_s14 }
 0x373   : > { %s1741_s10 = scalar_lea.hbm %s1740_s14, 16  ;;  %p1746_p10 = scmp.lt.s32.totalorder %s1740_s14, %s2286_s19 }
 0x374   : > { %p1742_p1 = scmp.ne.s32.totalorder %s1740_s14, %s1741_s10  ;;  %p1747_p12 = scmp.lt.s32.totalorder %s1745_s17, %s1741_s10 }
 0x376   : > { %p1743_p8 = pnand %p1742_p1, %p2022_p0  ;;  %p1748_p13 = por %p1747_p12, %p1746_p10 }
 0x378   : > { %p1744_p9 = pneg %p1743_p8 }
 0x379   : > { %v969_v55 = vpop.f32.mrf.mxu0 }
 0x37a   : > { %p1749_p2 = pnand %p1748_p13, %p1744_p9 }
 0x3a9   : > { %v903_v56 = vpop.permute.xlu2 %902 }
 0x3aa   : > { %906 = vst.msk [vmem:[#allocation4] sm:$0xff] %vm905_vm5, %v903_v56 }
 0x3c5   : > { %v1047_v58 = vpop.permute.xlu2 %1046 }
 0x3e4   : > { %v975_v57 = vpop.permute.xlu0 %974 }
 0x3e5   : > { %978 = vst.msk [vmem:[#allocation4] sm:$0xff] %vm977_vm6, %v975_v57 }
 0x3e6   : > { %1050 = vst.msk [vmem:[#allocation4] sm:$0xff] %vm1049_vm7, %v1047_v58 }
 0x3ed   : > { %v1051_v59 = vld [vmem:[#allocation4] sm:$0xff] }
 0x3ee   : > { %v1052_v60 = vadd.f32 %v1051_v59, %v2071_v4 }
 0x3f0   : > { %v1055_v61 = vsel %vm682_vm0, %v1052_v60, 0.0 }
 0x3f1   : > { %1056 = vadd.xlane.f32.xlu1 %v1055_v61 }
 0x464   : > { %v1057_v6 = vpop.xlane.xlu1 %1056 }
 0x465   : > { %v1065_v7 = vmul.f32 %v2136_v5, %v1057_v6 }
 0x467   : > { %v1066_v8 = vsub.f32 %v1052_v60, %v1065_v7 }
 0x469   : > { %v1067_v9 = vmul.f32 %v1066_v8, %v1066_v8 }
 0x46b   : > { %v1068_v4 = vsel %vm682_vm0, %v1067_v9, 0.0 }
 0x46c   : > { %1069 = vadd.xlane.f32.xlu0 %v1068_v4 }
 0x4df   : > { %v1070_v13 = vpop.xlane.xlu0 %1069 }
 0x4e0   : > { %v1071_v14 = vmul.f32 %v1070_v13, %v2136_v5 }
 0x4e2   : > { %v1072_v16 = vadd.f32 1e-05, %v1071_v14 }
 0x4e4   : > { %1631 = vrsqrt.f32 %v1072_v16  ;;  %vm1079_vm10 = vweird.f32 %v1072_v16 }
 0x4ea   : > { %v1632_v17 = vpop.eup %1631 }
 0x4eb   : > { %v1074_v18 = vmul.f32 %v1632_v17, %v1072_v16  ;;  %vm1080_vm9 = vweird.f32 %v1632_v17 }
 0x4ec   : > { %vm1081_vm11 = vmor %vm1079_vm10, %vm1080_vm9 }
 0x4ed   : > { %v1075_v19 = vmul.f32 %v1632_v17, %v1074_v18 }
 0x4ef   : > { %v1076_v20 = vmul.f32 0.5, %v1075_v19 }
 0x4f1   : > { %v1077_v21 = vsub.f32 1.5, %v1076_v20 }
 0x4f3   : > { %v1078_v22 = vmul.f32 %v1632_v17, %v1077_v21 }
 0x4f5   : > { %v1082_v24 = vsel %vm1081_vm11, %v1632_v17, %v1078_v22 }
 0x4f6   : > { %v1083_v26 = vmul.f32 %v1082_v24, %v1066_v8 }
 0x4f8   : > { %v1087_v27 = vmul.f32 %v1607_v23, %v1083_v26 }
 0x4fa   : > { %v1091_v28 = vadd.f32 %v1608_v25, %v1087_v27 }
 0x4fc   : > { %v1092_v29 = vpack.c.bf16 %v1091_v28, %v1091_v28 }
 0x4fe   : > { %1467 = vmatmul.msk.bf16.vlgmr.msra.gmra.mxu3 %vm682_vm0, %v1092_v29 }
 0x581   : > { %v1125_v33 = vpop.f32.mrf.mxu3 }
 0x582   : > { %v1126_v34 = vadd.f32 %v1609_v32, %v1125_v33 }
 0x584   : > { %v1129_v35 = vmax.f32 %v1126_v34, 0.0 }
 0x586   : > { %v1130_v36 = vpack.c.bf16 %v1129_v35, %v1129_v35 }
 0x588   : > { %1484 = vmatmul.msk.bf16.vlgmr.msrb.gmra.mxu0 %vm1167_vm12, %v1130_v36 }
 0x589   : > { %v1127_v37 = vpop.f32.mrf.mxu3 }
 0x605   : > { %v1180_v39 = vpop.f32.mrf.mxu0 }
 0x606   : > { %v1181_v40 = vadd.f32 %v1610_v38, %v1180_v39 }
 0x608   : > { %v1184_v41 = vadd.f32 %v1181_v40, %v1091_v28 }
 0x60a   : > { %v1187_v42 = vsel %vm682_vm0, %v1184_v41, 0.0 }
 0x60b   : > { %1188 = vadd.xlane.f32.xlu2 %v1187_v42 }
 0x60d   : > { %v1182_v43 = vpop.f32.mrf.mxu0 }
 0x67e   : > { %v1189_v44 = vpop.xlane.xlu2 %1188 }
 0x67f   : > { %v1190_v45 = vmul.f32 %v1189_v44, %v2136_v5 }
 0x681   : > { %v1191_v46 = vsub.f32 %v1184_v41, %v1190_v45 }
 0x683   : > { %v1192_v47 = vmul.f32 %v1191_v46, %v1191_v46 }
 0x685   : > { %v1193_v48 = vsel %vm682_vm0, %v1192_v47, 0.0 }
 0x686   : > { %1194 = vadd.xlane.f32.xlu1 %v1193_v48 }
 0x687   : > { %1752 = shalt.err (!%p1749_p2)
}
 0x688   : > { %s1856_s1 = smov 64   ;;  %s1857_s24 = smov 4  }
 0x689   : > { %1516 = dma.vmem_to_hbm [thread:$0]  (%p2022_p0), %s1253_s6, 256, %s1255_s22, %s1224_s30, %s1856_s1, %s1856_s1, %s1857_s24  }
 0x68a   : > { %s1418_s2 = sshll.u32 %s2042_s23, 3  ;;  %s1487_s3 = sshll.u32 %s1835_s27, 3 }
 0x68b   : > { %s2287_s28 = sld [smem:[#allocation29_spill]]  ;;  %s639_s27 = scalar_lea.vmem [#allocation11], %s1418_s2 }
 0x68c   : > { %s2288_s22 = sld [smem:[#allocation31_spill]]  ;;  %s1237_s13 = sshll.u32 %s639_s27, 4  ;;  %s1238_s13 = int_to_ptr.vmem [resolvable:$true] %s1237_s13 }
 0x68d   : > { %s2289_s11 = sld [smem:[#allocation30_spill]]  ;;  %s1219_s1 = scalar_lea.sflag [#allocation7], %s2042_s23 }
 0x691   : > { %v1611_v58 = vld [vmem:[%s2287_s28] ss:$0 sm:$0xff] }
 0x692   : > { %s1235_s30 = scalar_lea.hbm %s2288_s22, %s1487_s3  ;;  %s1773_s2 = scalar_lea.hbm %s2288_s22, 16 }
 0x693   : > { %v1612_v61 = vld [vmem:[%s2289_s11] ss:$0 sm:$0xff]  ;;  %s1239_s17 = sshll.u32 %s1235_s30, 4  ;;  %s1240_s17 = int_to_ptr.hbm [resolvable:$true] %s1239_s17 }
 0x694   : > { %s1767_s24 = sshra.s32 %s1240_s17, 4  ;;  %s1768_s24 = int_to_ptr.hbm [resolvable:$true] %s1767_s24 }
 0x695   : > { %s1769_s3 = scalar_lea.hbm %s1768_s24, 8  ;;  %p1774_p3 = scmp.lt.s32.totalorder %s1768_s24, %s2288_s22 }
 0x696   : > { %p1770_p4 = scmp.ne.s32.totalorder %s1768_s24, %s1769_s3  ;;  %p1775_p1 = scmp.lt.s32.totalorder %s1773_s2, %s1769_s3 }
 0x698   : > { %p1771_p7 = pnand %p1770_p4, %p2022_p0  ;;  %p1776_p8 = por %p1775_p1, %p1774_p3 }
 0x69a   : > { %p1772_p11 = pneg %p1771_p7 }
 0x69c   : > { %p1777_p9 = pnand %p1776_p8, %p1772_p11 }
 0x6f9   : > { %v1195_v49 = vpop.xlane.xlu1 %1194 }
 0x6fa   : > { %v1196_v50 = vmul.f32 %v1195_v49, %v2136_v5 }
 0x6fc   : > { %v1197_v51 = vadd.f32 1e-05, %v1196_v50 }
 0x6fe   : > { %1633 = vrsqrt.f32 %v1197_v51  ;;  %vm1204_vm14 = vweird.f32 %v1197_v51 }
 0x704   : > { %v1634_v52 = vpop.eup %1633 }
 0x705   : > { %v1199_v53 = vmul.f32 %v1634_v52, %v1197_v51  ;;  %vm1205_vm13 = vweird.f32 %v1634_v52 }
 0x706   : > { %vm1206_vm15 = vmor %vm1204_vm14, %vm1205_vm13 }
 0x707   : > { %v1200_v54 = vmul.f32 %v1634_v52, %v1199_v53 }
 0x709   : > { %v1201_v55 = vmul.f32 0.5, %v1200_v54 }
 0x70b   : > { %v1202_v56 = vsub.f32 1.5, %v1201_v55 }
 0x70d   : > { %v1203_v57 = vmul.f32 %v1634_v52, %v1202_v56 }
 0x70f   : > { %v1207_v59 = vsel %vm1206_vm15, %v1634_v52, %v1203_v57 }
 0x710   : > { %v1208_v60 = vmul.f32 %v1207_v59, %v1191_v46 }
 0x712   : > { %v1212_v62 = vmul.f32 %v1611_v58, %v1208_v60 }
 0x714   : > { %v1216_v63 = vadd.f32 %v1612_v61, %v1212_v62 }
 0x716   : > { %1217 = vst.msk [vmem:[%s639_s27] sm:$0xff] %vm682_vm0, %v1216_v63 }
 0x717   : > { %1780 = shalt.err (!%p1777_p9)
}
 0x718   : > { %1515 = dma.vmem_to_hbm [thread:$0]  (%p2022_p0), %s1238_s13, 128, %s1240_s17, %s1219_s1  }
 0x719 PF: > { %s2290_s23 = sld [smem:[#allocation18_spill]]  ;;  %p1531_p10 = pnand %p1411_p6, %p2029_p5 }
 0x71b   : > { %p1532_p12 = pneg %p1531_p10 }
 0x71f   : > { %s1269_s6 = sand.u32 1, %s2290_s23  }
 0x720   : > { %s1270_s30 = scalar_lea.sflag [#allocation7], %s1269_s6 }
 0x721   : > { %1814 = dma.done.wait (%p1532_p12), %s1270_s30, 128  }
 0x722   : > { %1816 = vsyncadd (%p1532_p12), %s1270_s30, 4294967168  ;;  %s1280_s14 = scalar_lea.sflag [#allocation13], %s1269_s6 }
 0x723   : > { %1818 = dma.done.wait (%p1532_p12), %s1280_s14, 256  }
 0x724   : > { %1820 = vsyncadd (%p1532_p12), %s1280_s14, 4294967040  ;;  %s38_s29 = sadd.s32 1, %s1843_s29   ;;  %s2291_s27 = sld [smem:[#allocation19_spill]] }
 0x725   : > { %p35_p13 = scmp.ge.s32.totalorder %s38_s29, 4   ;;  %s2292_s28 = sld [smem:[#allocation20_spill]] }
 0x726   : > { %s2293_s24 = smov %s1827_s25  ;;  %s2294_s25 = smov %s1831_s26 }
 0x727   : > { %s2295_s26 = smov %s2027_s0  ;;  %37 = sbr.rel (!%p35_p13) target bundleno = 22 (0x16), region = 164 }
 0x72c   :  { %1286 = vsyncpa [#allocation6], 1 }
 0x72d   :  { %1288 = vsyncpa [#allocation6 + $0x1], 1 }
 0x72e   :  { %1289 = vsyncpa [#allocation9], 1 }
 0x72f   :  { %1290 = vsyncpa [#allocation7], 1 }
 0x730   :  { %1292 = vsyncpa [#allocation7 + $0x1], 1 }
 0x731   :  { %1293 = vsyncpa [#allocation13], 1 }
 0x732   :  { %1295 = vsyncpa [#allocation13 + $0x1], 1 }

// kernel: tpu_custom_call.1
= control target key start
LH: loop header
LB: loop body
LE: loop exit
PB: predicated region body
PF: predicated region fallthrough
CT: control target
= control target key end

     0   :  { %s2232_s0 = inlined_call_operand.hbm [shape: bf16[2,8,32], index: 0, kind: input, shape index: {}]   ;;  %s2233_s1 = inlined_call_operand.vmem [shape: f32[2,8,32], index: 1, kind: input, shape index: {}]   ;;  %s2234_s2 = inlined_call_operand.vmem [shape: bf16[32,32], index: 2, kind: input, shape index: {}]   ;;  %s2235_s3 = inlined_call_operand.vmem [shape: f32[1,32], index: 3, kind: input, shape index: {}]   ;;  %s2236_s4 = inlined_call_operand.vmem [shape: bf16[32,32], index: 4, kind: input, shape index: {}]   ;;  %s2237_s5 = inlined_call_operand.vmem [shape: f32[1,32], index: 5, kind: input, shape index: {}]   ;;  %s2238_s6 = inlined_call_operand.hbm [shape: bf16[32,32], index: 6, kind: input, shape index: {}]   ;;  %s2239_s7 = inlined_call_operand.vmem [shape: f32[1,32], index: 7, kind: input, shape index: {}]   ;;  %s2240_s8 = inlined_call_operand.vmem [shape: f32[1,32], index: 8, kind: input, shape index: {}]   ;;  %s2241_s9 = inlined_call_operand.vmem [shape: f32[1,32], index: 9, kind: input, shape index: {}]   ;;  %s2242_s10 = inlined_call_operand.hbm [shape: bf16[32,64], index: 10, kind: input, shape index: {}]   ;;  %s2243_s11 = inlined_call_operand.vmem [shape: f32[1,64], index: 11, kind: input, shape index: {}]   ;;  %s2244_s12 = inlined_call_operand.vmem [shape: bf16[64,32], index: 12, kind: input, shape index: {}]   ;;  %s2245_s13 = inlined_call_operand.vmem [shape: f32[1,32], index: 13, kind: input, shape index: {}]   ;;  %s2246_s14 = inlined_call_operand.vmem [shape: f32[1,32], index: 14, kind: input, shape index: {}]   ;;  %s2247_s15 = inlined_call_operand.vmem [shape: f32[1,32], index: 15, kind: input, shape index: {}]   ;;  %s2248_s16 = inlined_call_operand.hbm [shape: f32[2,8,32], index: 16, kind: output, shape index: {0}]   ;;  %s2249_s17 = inlined_call_operand.hbm [shape: bf16[2,4,8,8], index: 17, kind: output, shape index: {1}]  }
   0x1   :  { %2256 = sst [smem:[#allocation21_spill]] %s2232_s0 }
   0x2   :  { %2257 = sst [smem:[#allocation22_spill]] %s2233_s1 }
   0x3   :  { %2258 = sst [smem:[#allocation23_spill]] %s2234_s2 }
   0x4   :  { %2259 = sst [smem:[#allocation24_spill]] %s2235_s3 }
   0x5   :  { %2260 = sst [smem:[#allocation25_spill]] %s2238_s6 }
   0x6   :  { %2261 = sst [smem:[#allocation26_spill]] %s2242_s10 }
   0x7   :  { %2262 = sst [smem:[#allocation27_spill]] %s2243_s11 }
   0x8   :  { %2263 = sst [smem:[#allocation28_spill]] %s2245_s13 }
   0x9   :  { %2264 = sst [smem:[#allocation29_spill]] %s2246_s14 }
   0xa   :  { %2265 = sst [smem:[#allocation30_spill]] %s2247_s15 }
   0xb   :  { %2266 = sst [smem:[#allocation31_spill]] %s2248_s16 }
   0xc   :  { %2267 = sst [smem:[#allocation32_spill]] %s2249_s17 }
   0xd   :  { %23 = vsyncpa [#allocation6], 0 }
   0xe   :  { %25 = vsyncpa [#allocation6 + $0x1], 0 }
   0xf   :  { %26 = vsyncpa [#allocation9], 0 }
  0x10   :  { %27 = vsyncpa [#allocation7], 0 }
  0x11   :  { %29 = vsyncpa [#allocation7 + $0x1], 0 }
  0x12   :  { %30 = vsyncpa [#allocation13], 0 }
  0x13   :  { %32 = vsyncpa [#allocation13 + $0x1], 0  ;;  %s1948_s24 = smov 0   ;;  %s1950_s25 = smov 0  }
  0x14   :  { %s1952_s26 = smov 0   ;;  %s1954_s27 = smov 0  }
  0x15   :  { %s1956_s28 = smov 0   ;;  %s1958_s29 = smov 0  }
  0x16 LB: > { %2268 = sst [smem:[#allocation18_spill]] %s1823_s24  ;;  %s2250_s0 = sadd.s32 4294967295, %s1843_s29   ;;  %s1843_s29 = sphi %s1958_s29, %s38_s29   ;;  %s1839_s28 = sphi %s1956_s28, %s2292_s28   ;;  %s1835_s27 = sphi %s1954_s27, %s2291_s27   ;;  %s1831_s26 = sphi %s1952_s26, %s2295_s26   ;;  %s1827_s25 = sphi %s1950_s25, %s2294_s25   ;;  %s1823_s24 = sphi %s1948_s24, %s2293_s24  }
  0x17   : > { %2269 = sst [smem:[#allocation19_spill]] %s1839_s28  ;;  %p1408_p0 = scmp.ge.s32.totalorder %s1843_s29, 1 }
  0x18   : > { %p1982_p1 = scmp.eq.s32.totalorder %s2250_s0, 0  ;;  %p459_p2 = scmp.lt.s32.totalorder %s1843_s29, 3 }
  0x19   : > { %s2271_s6 = sld [smem:[#allocation25_spill]]  ;;  %s1845_s21 = smov [#allocation8]  }
  0x1a   : > { %p1990_p3 = pnand %p1408_p0, %p459_p2  ;;  %s484_s22 = sshll.u32 %s1845_s21, 4  ;;  %s485_s22 = int_to_ptr.vmem [resolvable:$true] %s484_s22 }
  0x1b   : > { %p1411_p6 = scmp.ge.s32.totalorder %s1843_s29, 2  ;;  %s2273_s10 = sld [smem:[#allocation26_spill]] }
  0x1c   : > { %p1519_p4 = pneg %p1990_p3  ;;  %s1846_s0 = smov 64  }
  0x1d   : > { %s1848_s21 = smov [#allocation10]   ;;  %s50_s16 = sadd.s32 1, %s1839_s28 }
  0x1e   : > { %p1520_p5 = pnand %p1519_p4, %p1982_p1  ;;  %s507_s15 = sshll.u32 %s1848_s21, 4  ;;  %s508_s15 = int_to_ptr.vmem [resolvable:$true] %s507_s15 }
  0x1f   : > { %s482_s1 = sshll.u32 %s2271_s6, 4  ;;  %s1847_s6 = smov 4   ;;  %s483_s1 = int_to_ptr.hbm [resolvable:$true] %s482_s1 }
  0x20   : > { %1522 = dma.hbm_to_vmem [thread:$0]  (!%p1520_p5), %s483_s1, 256, %s485_s22, [#allocation9], %s1846_s0, %s1846_s0, %s1847_s6  }
  0x21   : > { %s505_s19 = sshll.u32 %s2273_s10, 4  ;;  %s1407_s14 = sadd.s32 4294967294, %s1843_s29   ;;  %s506_s19 = int_to_ptr.hbm [resolvable:$true] %s505_s19 }
  0x22   : > { %1525 = dma.hbm_to_vmem [thread:$0]  (!%p1520_p5), %s506_s19, 256, %s508_s15, [#allocation9], %s1846_s0, %s1846_s0, %s1847_s6  }
  0x23   : > { %p52_p7 = scmp.ge.s32.totalorder %s50_s16, 2  ;;  %s57_s23 = sadd.s32 1, %s1831_s26 }
  0x24   : > { %p64_p8 = scmp.ne.s32.totalorder %s1831_s26, %s1827_s25  ;;  %p65_p9 = scmp.eq.s32.totalorder %s1843_s29, 0 }
  0x25   : > { %s2297_s16 = smov (%p52_p7, %s50_s16), 0  ;;  %p70_p10 = scmp.ne.s32.totalorder %s1827_s25, %s1823_s24 }
  0x26   : > { %2274 = sst [smem:[#allocation20_spill]] %s2297_s16  ;;  %s54_s1 = ssub.s32 %s1839_s28, %s2297_s16 }
  0x27   : > { %s2275_s22 = sadd.s32 4294967295, %s1843_s29   ;;  %p55_p12 = scmp.eq.s32.totalorder %s54_s1, 0 }
  0x28   : > { %p418_p11 = scmp.eq.s32.totalorder %s2275_s22, 1  ;;  %p2018_p13 = por %p1982_p1, %p70_p10 }
  0x29   : > { %p424_p2 = scmp.eq.s32.totalorder %s1407_s14, 1  ;;  %p66_p4 = por %p65_p9, %p64_p8 }
  0x2a   : > { %p2022_p0 = por %p418_p11, %p64_p8  ;;  %s536_s19 = sand.u32 1, %s1831_s26  }
  0x2b   : > { %s2027_s0 = scalar_select %p55_p12, %s1831_s26, %s57_s23  }
  0x2c   : > { %p2029_p5 = por %p424_p2, %p70_p10  ;;  %s1413_s21 = sshll.u32 %s1839_s28, 2 }
  0x2d   : > { %p1539_p7 = scmp.lt.s32.totalorder %s1843_s29, 2  ;;  %s1412_s1 = sshll.u32 %s536_s19, 2 }
  0x2e   : > { %s2279_s16 = sld [smem:[#allocation21_spill]]  ;;  %s540_s13 = scalar_lea.vmem [#allocation5], %s1412_s1 }
  0x2f   : > { %s548_s11 = sshll.u32 %s540_s13, 4  ;;  %p1527_p11 = pnand %p1539_p7, %p66_p4  ;;  %s549_s11 = int_to_ptr.vmem [resolvable:$true] %s548_s11 }
  0x30   : > { %s537_s14 = scalar_lea.sflag [#allocation6], %s536_s19  ;;  %s2042_s23 = sand.u32 (!%p1990_p3), 1, %s1827_s25  }
  0x31   : > { %s1415_s28 = sshll.u32 (!%p1990_p3), %s2042_s23, 2  ;;  %s570_s10 = scalar_lea.sflag (!%p1990_p3), [#allocation6], %s2042_s23 }
  0x32   : > { %567 = sbr.rel (%p1990_p3) target bundleno = 1817 (0x719), region = 84 }
  0x34   : > { %s544_s24 = scalar_lea.hbm %s2279_s16, %s1413_s21  ;;  %s573_s16 = scalar_lea.vmem (!%p1990_p3), [#allocation5], %s1415_s28 }
  0x35   : > { %s546_s17 = sshll.u32 %s544_s24, 4  ;;  %s547_s17 = int_to_ptr.hbm [resolvable:$true] %s546_s17 }
  0x36   : > { %1529 = dma.hbm_to_vmem [thread:$0]  (!%p1527_p11), %s547_s17, 64, %s549_s11, %s537_s14  }
  0x37   : > { %1806 = dma.done.wait (%p2018_p13), %s570_s10, 64  }
  0x38   : > { %1808 = vsyncadd (%p2018_p13), %s570_s10, 4294967232 }
  0x39   : > { %1810 = dma.done.wait (%p1982_p1), [#allocation9], 512  }
  0x3a   : > { %1812 = vsyncadd (%p1982_p1), [#allocation9], 4294966784  ;;  %p647_p3 = scmp.lt.s32.totalorder %s1835_s27, 1  ;;  %s2280_s20 = sld [smem:[#allocation22_spill]]  ;;  %v1493_v0 = vld [vmem:[%s2236_s4 + $0x8] sm:$0xff]  ;;  %v1492_v2 = vld [vmem:[%s2236_s4] sm:$0xff] }
  0x3b   : > { %s2281_s2 = sld [smem:[#allocation23_spill]]  ;;  %692 = vmatpush.bf16.msra.mxu0 %v1493_v0  ;;  %v661_v6 = vld [vmem:[%s573_s16] sm:$0xf]  ;;  %vm682_vm0 = vcmask 261120   ;;  %v1604_v7 = vld [vmem:[%s2237_s5] ss:$0 sm:$0xff] }
  0x3c   : > { %s648_s11 = scalar_select %p647_p3, %s1835_s27, 1  ;;  %vm700_vm1 = vcmask 257024   ;;  %vm777_vm2 = vcmask 64512   ;;  %v1495_v30 = vld [vmem:[#allocation8 + $0x8] sm:$0xff]  ;;  %v1494_v31 = vld [vmem:[#allocation8] sm:$0xff]  ;;  %vm812_vm3 = vcmask 1043456  }
  0x3d   : > { %s2282_s3 = sld [smem:[#allocation24_spill]]  ;;  %s1849_s16 = smov 112   ;;  %728 = vmatpush.bf16.msra.mxu1 %v1495_v30  ;;  %v1606_v44 = vld [vmem:[%s2239_s7] ss:$0 sm:$0xff]  ;;  %vm829_vm4 = vcmask 60416   ;;  %vm905_vm5 = vcmask 130112  }
  0x3e   : > { %s1420_s13 = sshll.u32 %s648_s11, 3  ;;  %s1419_s6 = sshll.u32 %s2042_s23, 4  ;;  %vm977_vm6 = vcmask 195712   ;;  %vm1049_vm7 = vcmask 261312   ;;  %vm1167_vm12 = vcmask 523264  }
  0x3f   : > { %693 = vmatpush.bf16.msra.mxu0 %v1492_v2  ;;  %s2113_s1 = scalar_lea.vmem [#allocation12], %s1419_s6  ;;  %s1852_s22 = smov 8  }
  0x40   : > { %s653_s28 = scalar_lea.vmem %s2280_s20, %s1420_s13  ;;  %s1850_s20 = smov 120  }
  0x41   : > { %v1497_v1 = vld [vmem:[%s2281_s2 + $0x8] sm:$0xff]  ;;  %v1496_v3 = vld [vmem:[%s2281_s2] sm:$0xff]  ;;  %729 = vmatpush.bf16.msra.mxu1 %v1494_v31  ;;  %s1853_s30 = smov 24   ;;  %s1854_s14 = smov 16  }
  0x42   : > { %767 = vmatpush.bf16.msra.mxu2 %v1497_v1  ;;  %v2071_v4 = vld [vmem:[%s653_s28] sm:$0xff]  ;;  %1429 = vmatmul.msk.bf16.vlgmr.msra.gmra.mxu0 %vm682_vm0, %v661_v6  ;;  %s1851_s28 = smov 104   ;;  %s2283_s10 = sld [smem:[#allocation27_spill]] }
  0x43   : > { %v656_v5 = vpack.c.bf16 %v2071_v4, %v2071_v4  ;;  %v1605_v11 = vld [vmem:[%s2282_s3] ss:$0 sm:$0xff]  ;;  %s2284_s17 = sld [smem:[#allocation28_spill]]  ;;  %s1504_s24 = sshll.u32 %s1835_s27, 4 }
  0x44   : > { %1438 = vmatmul.msk.bf16.vlgmr.msra.gmra.mxu1 %vm682_vm0, %v661_v6  ;;  %s1252_s6 = sshll.u32 %s2113_s1, 4  ;;  %s1253_s6 = int_to_ptr.vmem [resolvable:$true] %s1252_s6 }
  0x46   : > { %768 = vmatpush.bf16.msra.mxu2 %v1496_v3 }
  0x49   : > { %1447 = vmatmul.msk.bf16.vlgmr.msra.gmra.mxu2 %vm682_vm0, %v656_v5 }
  0xbf   : > { %v695_v8 = vpop.f32.mrf.mxu0 }
  0xc0   : > { %v696_v9 = vadd.f32 %v1604_v7, %v695_v8 }
  0xc1   : > { %v731_v45 = vpop.f32.mrf.mxu1 }
  0xc2   : > { %v699_v10 = vpack.c.bf16 %v696_v9, %v696_v9  ;;  %v732_v46 = vadd.f32 %v1606_v44, %v731_v45 }
  0xc4   : > { %701 = vst.msk [vmem:[#allocation2] sm:$0xf] %vm700_vm1, %v699_v10  ;;  %v735_v47 = vpack.c.bf16 %v732_v46, %v732_v46 }
  0xc6   : > { %736 = vst.msk [vmem:[#allocation3] sm:$0xf] %vm700_vm1, %v735_v47 }
  0xc7   : > { %v697_v14 = vpop.f32.mrf.mxu0 }
  0xc9   : > { %v733_v48 = vpop.f32.mrf.mxu1 }
  0xcb   : > { %v775_v17 = vld [vmem:[#allocation2] sm:$0xf] }
  0xcc   : > { %v770_v12 = vpop.f32.mrf.mxu2  ;;  %v907_v18 = vld [vmem:[#allocation2] sm:$0xf]  ;;  %v782_v21 = vsel %vm777_vm2, %v775_v17, 0 }
  0xcd   : > { %v771_v13 = vadd.f32 %v1605_v11, %v770_v12  ;;  %v832_v19 = vld [vmem:[#allocation2] sm:$0xf]  ;;  %v912_v22 = vunpack.c.l.b16 %v907_v18  ;;  %791 = vmatpush.bf16.xpose.msra.mxu3 %v782_v21  ;;  %v776_v49 = vld [vmem:[#allocation3] sm:$0xf] }
  0xce   : > { %v840_v23 = vunpack.c.l.b16 %v832_v19  ;;  %v979_v27 = vld [vmem:[#allocation2] sm:$0xf]  ;;  %v814_v50 = vsel %vm812_vm3, %v776_v49, 0  ;;  %v833_v1 = vld [vmem:[#allocation3] sm:$0xf] }
  0xcf   : > { %v774_v15 = vpack.c.bf16 %v771_v13, %v771_v13  ;;  %v913_v25 = vpack.c.b16 %v912_v22, %v912_v22  ;;  %v984_v28 = vunpack.c.l.b16 %v979_v27  ;;  %823 = vmatpush.bf16.msrb.mxu0 %v814_v50  ;;  %v876_v2 = vunpack.c.l.b16 %v833_v1 }
  0xd0   : > { %v841_v26 = vpack.c.b16 %v840_v23, %v840_v23 }
  0xd1   : > { %v835_v16 = vunpack.c.l.b16 %v774_v15  ;;  %914 = vrot.lane.b32.xlu1 %v913_v25, %s1849_s16  ;;  %v985_v29 = vpack.c.b16 %v984_v28, %v984_v28  ;;  %v877_v3 = vpack.c.b16 %v876_v2, %v876_v2 }
  0xd2   : > { %842 = vrot.lane.b32.xlu0 %v841_v26, %s1850_s20  ;;  %v980_v26 = vld [vmem:[#allocation3] sm:$0xf] }
  0xd3   : > { %v836_v20 = vpack.c.b16 %v835_v16, %v835_v16  ;;  %v1020_v27 = vunpack.c.l.b16 %v980_v26 }
  0xd4   : > { %v772_v24 = vpop.f32.mrf.mxu2  ;;  %1448 = vmatmul.msk.bf16.vlgmr.msra.gmra.mxu3 %vm777_vm2, %v774_v15 }
  0xd5   : > { %909 = vrot.lane.b32.xlu2 %v836_v20, %s1849_s16  ;;  %v1021_v28 = vpack.c.b16 %v1020_v27, %v1020_v27 }
  0xd9   : > { %986 = vrot.lane.b32.xlu1 %v985_v29, %s1851_s28  ;;  %v908_v29 = vld [vmem:[#allocation3] sm:$0xf] }
  0xda   : > { %837 = vrot.lane.b32.xlu0 %v836_v20, %s1850_s20  ;;  %v948_v30 = vunpack.c.l.b16 %v908_v29 }
  0xdc   : > { %v949_v31 = vpack.c.b16 %v948_v30, %v948_v30  ;;  %v1501_v30 = vld [vmem:[%s2244_s12 + $0x8] sm:$0xff] }
  0xdd   : > { %981 = vrot.lane.b32.xlu2 %v836_v20, %s1851_s28 }
 0x12f   : > { %v910_v36 = vpop.permute.xlu2 %909 }
 0x137   : > { %v982_v42 = vpop.permute.xlu2 %981 }
 0x143   : > { %v915_v32 = vpop.permute.xlu1 %914 }
 0x144   : > { %v843_v33 = vpop.permute.xlu0 %842  ;;  %v920_v35 = vsel %vm777_vm2, %v915_v32, 0 }
 0x145   : > { %v848_v34 = vsel %vm777_vm2, %v843_v33, 0  ;;  %929 = vmatpush.bf16.xpose.msrb.mxu3 %v920_v35 }
 0x146   : > { %857 = vmatpush.bf16.xpose.msrb.mxu1 %v848_v34 }
 0x14b   : > { %v987_v37 = vpop.permute.xlu1 %986 }
 0x14c   : > { %v838_v38 = vpop.permute.xlu0 %837  ;;  %v992_v39 = vsel %vm777_vm2, %v987_v37, 0  ;;  %1453 = vmatmul.msk.bf16.vlgmr.msrb.gmra.mxu3 %vm777_vm2, %v910_v36 }
 0x14d   : > { %1450 = vmatmul.msk.bf16.vlgmr.msrb.gmra.mxu1 %vm777_vm2, %v838_v38 }
 0x14e   : > { %1001 = vmatpush.bf16.xpose.msra.mxu1 %v992_v39 }
 0x157   : > { %v793_v40 = vpop.f32.mrf.mxu3 }
 0x158   : > { %v797_v41 = vsel %vm777_vm2, %v793_v40, -inf }
 0x159   : > { %798 = vmax.xlane.f32.xlu1 %v797_v41 }
 0x15d   : > { %1456 = vmatmul.msk.bf16.vlgmr.msra.gmra.mxu1 %vm777_vm2, %v982_v42 }
 0x15f   : > { %v795_v43 = vpop.f32.mrf.mxu3 }
 0x1ca   : > { %v859_v51 = vpop.f32.mrf.mxu1 }
 0x1cb   : > { %v863_v52 = vsel %vm777_vm2, %v859_v51, -inf }
 0x1cc   : > { %864 = vmax.xlane.f32.xlu0 %v863_v52  ;;  %v799_v53 = vpop.xlane.xlu1 %798 }
 0x1cd   : > { %v800_v54 = vsub.f32 %v793_v40, %v799_v53 }
 0x1cf   : > { %v931_v55 = vpop.f32.mrf.mxu3  ;;  %v801_v56 = vmul.f32 1.442695, %v800_v54 }
 0x1d0   : > { %v935_v0 = vsel %vm777_vm2, %v931_v55, -inf }
 0x1d1   : > { %1613 = vpow2.f32 %v801_v56 }
 0x1d2   : > { %v861_v57 = vpop.f32.mrf.mxu1 }
 0x1d7   : > { %v933_v58 = vpop.f32.mrf.mxu3  ;;  %v1614_v59 = vpop.eup %1613 }
 0x1d8   : > { %v803_v61 = vsel %vm777_vm2, %v1614_v59, 0.0 }
 0x1d9   : > { %804 = vadd.xlane.f32.xlu1 %v803_v61 }
 0x1da   : > { %v1003_v60 = vpop.f32.mrf.mxu1 }
 0x1db   : > { %v1007_v62 = vsel %vm777_vm2, %v1003_v60, -inf }
 0x1dc   : > { %1008 = vmax.xlane.f32.xlu2 %v1007_v62  ;;  %v1855_v62 = vmov 32.0  }
 0x1e2   : > { %v1005_v63 = vpop.f32.mrf.mxu1 }
 0x1e4   : > { %936 = vmax.xlane.f32.xlu2 %v935_v0 }
 0x1fc   : > { %878 = vrot.lane.b32.xlu2 %v877_v3, %s1850_s20 }
 0x23f   : > { %v865_v5 = vpop.xlane.xlu0 %864 }
 0x240   : > { %v866_v6 = vsub.f32 %v859_v51, %v865_v5 }
 0x242   : > { %v867_v7 = vmul.f32 1.442695, %v866_v6 }
 0x244   : > { %1615 = vpow2.f32 %v867_v7 }
 0x24a   : > { %v1616_v8 = vpop.eup %1615 }
 0x24b   : > { %v869_v9 = vsel %vm777_vm2, %v1616_v8, 0.0 }
 0x24c   : > { %870 = vadd.xlane.f32.xlu0 %v869_v9  ;;  %v805_v10 = vpop.xlane.xlu1 %804 }
 0x24d   : > { %1617 = vrcp.f32 %v805_v10  ;;  %v1499_v10 = vld [vmem:[#allocation10 + $0x8] sm:$0xff] }
 0x24e   : > { %1122 = vmatpush.bf16.msra.mxu3 %v1499_v10 }
 0x24f   : > { %v1009_v11 = vpop.xlane.xlu2 %1008 }
 0x250   : > { %v1010_v12 = vsub.f32 %v1003_v60, %v1009_v11  ;;  %v1498_v11 = vld [vmem:[#allocation10] sm:$0xff] }
 0x252   : > { %v1011_v13 = vmul.f32 1.442695, %v1010_v12  ;;  %1123 = vmatpush.bf16.msra.mxu3 %v1498_v11  ;;  %v1503_v12 = vld [vmem:[%s2244_s12 + $0x18] sm:$0xff] }
 0x253   : > { %v1618_v14 = vpop.eup %1617 }
 0x254   : > { %1619 = vpow2.f32 %v1011_v13  ;;  %v807_v15 = vmul.f32 %v1618_v14, %v1614_v59 }
 0x256   : > { %v808_v18 = vpack.c.bf16 %v807_v15, %v807_v15  ;;  %v1502_v15 = vld [vmem:[%s2244_s12 + $0x10] sm:$0xff] }
 0x257   : > { %v937_v16 = vpop.xlane.xlu2 %936 }
 0x258   : > { %v938_v17 = vsub.f32 %v931_v55, %v937_v16  ;;  %1449 = vmatmul.msk.bf16.vlgmr.msrb.gmra.mxu0 %vm777_vm2, %v808_v18  ;;  %830 = vst.msk [vmem:[%s2113_s1] sm:$0xf] %vm829_vm4, %v808_v18 }
 0x25a   : > { %v1620_v19 = vpop.eup %1619  ;;  %v939_v20 = vmul.f32 1.442695, %v938_v17 }
 0x25b   : > { %v1013_v21 = vsel %vm777_vm2, %v1620_v19, 0.0 }
 0x25c   : > { %1621 = vpow2.f32 %v939_v20  ;;  %1014 = vadd.xlane.f32.xlu0 %v1013_v21 }
 0x25f   : > { %v879_v22 = vpop.permute.xlu2 %878 }
 0x260   : > { %v884_v23 = vsel %vm812_vm3, %v879_v22, 0 }
 0x261   : > { %893 = vmatpush.bf16.msrb.mxu2 %v884_v23  ;;  %v1607_v23 = vld [vmem:[%s2240_s8] ss:$0 sm:$0xff] }
 0x262   : > { %v1622_v24 = vpop.eup %1621 }
 0x263   : > { %v941_v25 = vsel %vm777_vm2, %v1622_v24, 0.0 }
 0x264   : > { %942 = vadd.xlane.f32.xlu1 %v941_v25  ;;  %v1608_v25 = vld [vmem:[%s2241_s9] ss:$0 sm:$0xff] }
 0x270   : > { %1022 = vrot.lane.b32.xlu0 %v1021_v28, %s1851_s28  ;;  %s2285_s28 = sld [smem:[#allocation32_spill]] }
 0x276   : > { %s2286_s19 = smov %s2285_s28  ;;  %s1251_s21 = scalar_lea.hbm %s2285_s28, %s1504_s24 }
 0x27d   : > { %950 = vrot.lane.b32.xlu1 %v949_v31, %s1849_s16  ;;  %v1500_v31 = vld [vmem:[%s2244_s12] sm:$0xff] }
 0x2bf   : > { %v871_v32 = vpop.xlane.xlu0 %870 }
 0x2c0   : > { %1623 = vrcp.f32 %v871_v32  ;;  %v1609_v32 = vld [vmem:[%s2283_s10] ss:$0 sm:$0xff] }
 0x2c6   : > { %v1624_v33 = vpop.eup %1623 }
 0x2c7   : > { %v873_v34 = vmul.f32 %v1624_v33, %v1616_v8 }
 0x2c9   : > { %v874_v35 = vpack.c.bf16 %v873_v34, %v873_v34 }
 0x2cb   : > { %1451 = vmatmul.msk.bf16.vlgmr.msrb.gmra.mxu2 %vm777_vm2, %v874_v35  ;;  %1452 = vst.msk [vmem:[%s2113_s1 + $0x4] sm:$0xf] %vm829_vm4, %v874_v35 }
 0x2cf   : > { %v1015_v36 = vpop.xlane.xlu0 %1014 }
 0x2d0   : > { %1625 = vrcp.f32 %v1015_v36 }
 0x2d5   : > { %v825_v39 = vpop.f32.mrf.mxu0 }
 0x2d6   : > { %v1626_v37 = vpop.eup %1625  ;;  %831 = vst.msk [vmem:[#allocation4] sm:$0xff] %vm777_vm2, %v825_v39 }
 0x2d7   : > { %v1017_v38 = vmul.f32 %v1626_v37, %v1620_v19  ;;  %v943_v40 = vpop.xlane.xlu1 %942 }
 0x2d8   : > { %1627 = vrcp.f32 %v943_v40 }
 0x2d9   : > { %v1018_v41 = vpack.c.bf16 %v1017_v38, %v1017_v38  ;;  %1629 = vrcp.f32 %v1855_v62  ;;  %v1610_v38 = vld [vmem:[%s2284_s17] ss:$0 sm:$0xff]  ;;  %s1745_s17 = scalar_lea.hbm %s2286_s19, 32 }
 0x2db   : > { %1458 = vst.msk [vmem:[%s2113_s1 + $0xc] sm:$0xf] %vm829_vm4, %v1018_v41 }
 0x2dd   : > { %v827_v44 = vpop.f32.mrf.mxu0 }
 0x2de   : > { %v1628_v42 = vpop.eup %1627 }
 0x2df   : > { %v945_v43 = vmul.f32 %v1628_v42, %v1622_v24  ;;  %v1630_v63 = vpop.eup %1629 }
 0x2e0   : > { %v1059_v0 = vmul.f32 32.0, %v1630_v63  ;;  %vm1063_vm8 = vweird.f32 %v1630_v63 }
 0x2e1   : > { %v946_v45 = vpack.c.bf16 %v945_v43, %v945_v43 }
 0x2e2   : > { %v1023_v46 = vpop.permute.xlu0 %1022  ;;  %v1060_v1 = vsub.f32 1.0, %v1059_v0 }
 0x2e3   : > { %1455 = vst.msk [vmem:[%s2113_s1 + $0x8] sm:$0xf] %vm829_vm4, %v946_v45  ;;  %v1028_v47 = vsel %vm812_vm3, %v1023_v46, 0 }
 0x2e4   : > { %1037 = vmatpush.bf16.msra.mxu2 %v1028_v47  ;;  %v1061_v2 = vmul.f32 %v1630_v63, %v1060_v1 }
 0x2e6   : > { %v1062_v3 = vadd.f32 %v1630_v63, %v1061_v2 }
 0x2e7   : > { %1457 = vmatmul.msk.bf16.vlgmr.msra.gmra.mxu2 %vm777_vm2, %v1018_v41 }
 0x2e8   : > { %v2136_v5 = vsel %vm1063_vm8, %v1630_v63, %v1062_v3 }
 0x2ef   : > { %v951_v48 = vpop.permute.xlu1 %950 }
 0x2f0   : > { %v956_v49 = vsel %vm812_vm3, %v951_v48, 0 }
 0x2f1   : > { %965 = vmatpush.bf16.msra.mxu0 %v956_v49 }
 0x2f4   : > { %1454 = vmatmul.msk.bf16.vlgmr.msra.gmra.mxu0 %vm777_vm2, %v946_v45 }
 0x2f5   : > { %1175 = vmatpush.bf16.msrb.mxu0 %v1503_v12 }
 0x2f9   : > { %1176 = vmatpush.bf16.msrb.mxu0 %v1502_v15 }
 0x2fd   : > { %1177 = vmatpush.bf16.msrb.mxu0 %v1501_v30 }
 0x301   : > { %1178 = vmatpush.bf16.msrb.mxu0 %v1500_v31 }
 0x34e   : > { %v895_v50 = vpop.f32.mrf.mxu2 }
 0x34f   : > { %902 = vrot.lane.b32.xlu2 %v895_v50, %s1852_s22  ;;  %s1254_s22 = sshll.u32 %s1251_s21, 4  ;;  %s1255_s22 = int_to_ptr.hbm [resolvable:$true] %s1254_s22 }
 0x356   : > { %v897_v51 = vpop.f32.mrf.mxu2 }
 0x36a   : > { %v1039_v52 = vpop.f32.mrf.mxu2 }
 0x36b   : > { %1046 = vrot.lane.b32.xlu2 %v1039_v52, %s1853_s30  ;;  %s1224_s30 = scalar_lea.sflag [#allocation13], %s2042_s23 }
 0x371   : > { %v967_v53 = vpop.f32.mrf.mxu0 }
 0x372   : > { %974 = vrot.lane.b32.xlu0 %v967_v53, %s1854_s14  ;;  %v1041_v54 = vpop.f32.mrf.mxu2  ;;  %s1739_s14 = sshra.s32 %s1255_s22, 4  ;;  %s1740_s14 = int_to_ptr.hbm [resolvable:$true] %s1739_s14 }
 0x373   : > { %s1741_s10 = scalar_lea.hbm %s1740_s14, 16  ;;  %p1746_p10 = scmp.lt.s32.totalorder %s1740_s14, %s2286_s19 }
 0x374   : > { %p1742_p1 = scmp.ne.s32.totalorder %s1740_s14, %s1741_s10  ;;  %p1747_p12 = scmp.lt.s32.totalorder %s1745_s17, %s1741_s10 }
 0x376   : > { %p1743_p8 = pnand %p1742_p1, %p2022_p0  ;;  %p1748_p13 = por %p1747_p12, %p1746_p10 }
 0x378   : > { %p1744_p9 = pneg %p1743_p8 }
 0x379   : > { %v969_v55 = vpop.f32.mrf.mxu0 }
 0x37a   : > { %p1749_p2 = pnand %p1748_p13, %p1744_p9 }
 0x3a9   : > { %v903_v56 = vpop.permute.xlu2 %902 }
 0x3aa   : > { %906 = vst.msk [vmem:[#allocation4] sm:$0xff] %vm905_vm5, %v903_v56 }
 0x3c5   : > { %v1047_v58 = vpop.permute.xlu2 %1046 }
 0x3e4   : > { %v975_v57 = vpop.permute.xlu0 %974 }
 0x3e5   : > { %978 = vst.msk [vmem:[#allocation4] sm:$0xff] %vm977_vm6, %v975_v57 }
 0x3e6   : > { %1050 = vst.msk [vmem:[#allocation4] sm:$0xff] %vm1049_vm7, %v1047_v58 }
 0x3ed   : > { %v1051_v59 = vld [vmem:[#allocation4] sm:$0xff] }
 0x3ee   : > { %v1052_v60 = vadd.f32 %v1051_v59, %v2071_v4 }
 0x3f0   : > { %v1055_v61 = vsel %vm682_vm0, %v1052_v60, 0.0 }
 0x3f1   : > { %1056 = vadd.xlane.f32.xlu1 %v1055_v61 }
 0x464   : > { %v1057_v6 = vpop.xlane.xlu1 %1056 }
 0x465   : > { %v1065_v7 = vmul.f32 %v2136_v5, %v1057_v6 }
 0x467   : > { %v1066_v8 = vsub.f32 %v1052_v60, %v1065_v7 }
 0x469   : > { %v1067_v9 = vmul.f32 %v1066_v8, %v1066_v8 }
 0x46b   : > { %v1068_v4 = vsel %vm682_vm0, %v1067_v9, 0.0 }
 0x46c   : > { %1069 = vadd.xlane.f32.xlu0 %v1068_v4 }
 0x4df   : > { %v1070_v13 = vpop.xlane.xlu0 %1069 }
 0x4e0   : > { %v1071_v14 = vmul.f32 %v1070_v13, %v2136_v5 }
 0x4e2   : > { %v1072_v16 = vadd.f32 1e-05, %v1071_v14 }
 0x4e4   : > { %1631 = vrsqrt.f32 %v1072_v16  ;;  %vm1079_vm10 = vweird.f32 %v1072_v16 }
 0x4ea   : > { %v1632_v17 = vpop.eup %1631 }
 0x4eb   : > { %v1074_v18 = vmul.f32 %v1632_v17, %v1072_v16  ;;  %vm1080_vm9 = vweird.f32 %v1632_v17 }
 0x4ec   : > { %vm1081_vm11 = vmor %vm1079_vm10, %vm1080_vm9 }
 0x4ed   : > { %v1075_v19 = vmul.f32 %v1632_v17, %v1074_v18 }
 0x4ef   : > { %v1076_v20 = vmul.f32 0.5, %v1075_v19 }
 0x4f1   : > { %v1077_v21 = vsub.f32 1.5, %v1076_v20 }
 0x4f3   : > { %v1078_v22 = vmul.f32 %v1632_v17, %v1077_v21 }
 0x4f5   : > { %v1082_v24 = vsel %vm1081_vm11, %v1632_v17, %v1078_v22 }
 0x4f6   : > { %v1083_v26 = vmul.f32 %v1082_v24, %v1066_v8 }
 0x4f8   : > { %v1087_v27 = vmul.f32 %v1607_v23, %v1083_v26 }
 0x4fa   : > { %v1091_v28 = vadd.f32 %v1608_v25, %v1087_v27 }
 0x4fc   : > { %v1092_v29 = vpack.c.bf16 %v1091_v28, %v1091_v28 }
 0x4fe   : > { %1467 = vmatmul.msk.bf16.vlgmr.msra.gmra.mxu3 %vm682_vm0, %v1092_v29 }
 0x581   : > { %v1125_v33 = vpop.f32.mrf.mxu3 }
 0x582   : > { %v1126_v34 = vadd.f32 %v1609_v32, %v1125_v33 }
 0x584   : > { %v1129_v35 = vmax.f32 %v1126_v34, 0.0 }
 0x586   : > { %v1130_v36 = vpack.c.bf16 %v1129_v35, %v1129_v35 }
 0x588   : > { %1484 = vmatmul.msk.bf16.vlgmr.msrb.gmra.mxu0 %vm1167_vm12, %v1130_v36 }
 0x589   : > { %v1127_v37 = vpop.f32.mrf.mxu3 }
 0x605   : > { %v1180_v39 = vpop.f32.mrf.mxu0 }
 0x606   : > { %v1181_v40 = vadd.f32 %v1610_v38, %v1180_v39 }
 0x608   : > { %v1184_v41 = vadd.f32 %v1181_v40, %v1091_v28 }
 0x60a   : > { %v1187_v42 = vsel %vm682_vm0, %v1184_v41, 0.0 }
 0x60b   : > { %1188 = vadd.xlane.f32.xlu2 %v1187_v42 }
 0x60d   : > { %v1182_v43 = vpop.f32.mrf.mxu0 }
 0x67e   : > { %v1189_v44 = vpop.xlane.xlu2 %1188 }
 0x67f   : > { %v1190_v45 = vmul.f32 %v1189_v44, %v2136_v5 }
 0x681   : > { %v1191_v46 = vsub.f32 %v1184_v41, %v1190_v45 }
 0x683   : > { %v1192_v47 = vmul.f32 %v1191_v46, %v1191_v46 }
 0x685   : > { %v1193_v48 = vsel %vm682_vm0, %v1192_v47, 0.0 }
 0x686   : > { %1194 = vadd.xlane.f32.xlu1 %v1193_v48 }
 0x687   : > { %1752 = shalt.err (!%p1749_p2)
}
 0x688   : > { %s1856_s1 = smov 64   ;;  %s1857_s24 = smov 4  }
 0x689   : > { %1516 = dma.vmem_to_hbm [thread:$0]  (%p2022_p0), %s1253_s6, 256, %s1255_s22, %s1224_s30, %s1856_s1, %s1856_s1, %s1857_s24  }
 0x68a   : > { %s1418_s2 = sshll.u32 %s2042_s23, 3  ;;  %s1487_s3 = sshll.u32 %s1835_s27, 3 }
 0x68b   : > { %s2287_s28 = sld [smem:[#allocation29_spill]]  ;;  %s639_s27 = scalar_lea.vmem [#allocation11], %s1418_s2 }
 0x68c   : > { %s2288_s22 = sld [smem:[#allocation31_spill]]  ;;  %s1237_s13 = sshll.u32 %s639_s27, 4  ;;  %s1238_s13 = int_to_ptr.vmem [resolvable:$true] %s1237_s13 }
 0x68d   : > { %s2289_s11 = sld [smem:[#allocation30_spill]]  ;;  %s1219_s1 = scalar_lea.sflag [#allocation7], %s2042_s23 }
 0x691   : > { %v1611_v58 = vld [vmem:[%s2287_s28] ss:$0 sm:$0xff] }
 0x692   : > { %s1235_s30 = scalar_lea.hbm %s2288_s22, %s1487_s3  ;;  %s1773_s2 = scalar_lea.hbm %s2288_s22, 16 }
 0x693   : > { %v1612_v61 = vld [vmem:[%s2289_s11] ss:$0 sm:$0xff]  ;;  %s1239_s17 = sshll.u32 %s1235_s30, 4  ;;  %s1240_s17 = int_to_ptr.hbm [resolvable:$true] %s1239_s17 }
 0x694   : > { %s1767_s24 = sshra.s32 %s1240_s17, 4  ;;  %s1768_s24 = int_to_ptr.hbm [resolvable:$true] %s1767_s24 }
 0x695   : > { %s1769_s3 = scalar_lea.hbm %s1768_s24, 8  ;;  %p1774_p3 = scmp.lt.s32.totalorder %s1768_s24, %s2288_s22 }
 0x696   : > { %p1770_p4 = scmp.ne.s32.totalorder %s1768_s24, %s1769_s3  ;;  %p1775_p1 = scmp.lt.s32.totalorder %s1773_s2, %s1769_s3 }
 0x698   : > { %p1771_p7 = pnand %p1770_p4, %p2022_p0  ;;  %p1776_p8 = por %p1775_p1, %p1774_p3 }
 0x69a   : > { %p1772_p11 = pneg %p1771_p7 }
 0x69c   : > { %p1777_p9 = pnand %p1776_p8, %p1772_p11 }
 0x6f9   : > { %v1195_v49 = vpop.xlane.xlu1 %1194 }
 0x6fa   : > { %v1196_v50 = vmul.f32 %v1195_v49, %v2136_v5 }
 0x6fc   : > { %v1197_v51 = vadd.f32 1e-05, %v1196_v50 }
 0x6fe   : > { %1633 = vrsqrt.f32 %v1197_v51  ;;  %vm1204_vm14 = vweird.f32 %v1197_v51 }
 0x704   : > { %v1634_v52 = vpop.eup %1633 }
 0x705   : > { %v1199_v53 = vmul.f32 %v1634_v52, %v1197_v51  ;;  %vm1205_vm13 = vweird.f32 %v1634_v52 }
 0x706   : > { %vm1206_vm15 = vmor %vm1204_vm14, %vm1205_vm13 }
 0x707   : > { %v1200_v54 = vmul.f32 %v1634_v52, %v1199_v53 }
 0x709   : > { %v1201_v55 = vmul.f32 0.5, %v1200_v54 }
 0x70b   : > { %v1202_v56 = vsub.f32 1.5, %v1201_v55 }
 0x70d   : > { %v1203_v57 = vmul.f32 %v1634_v52, %v1202_v56 }
 0x70f   : > { %v1207_v59 = vsel %vm1206_vm15, %v1634_v52, %v1203_v57 }
 0x710   : > { %v1208_v60 = vmul.f32 %v1207_v59, %v1191_v46 }
 0x712   : > { %v1212_v62 = vmul.f32 %v1611_v58, %v1208_v60 }
 0x714   : > { %v1216_v63 = vadd.f32 %v1612_v61, %v1212_v62 }
 0x716   : > { %1217 = vst.msk [vmem:[%s639_s27] sm:$0xff] %vm682_vm0, %v1216_v63 }
 0x717   : > { %1780 = shalt.err (!%p1777_p9)
}
 0x718   : > { %1515 = dma.vmem_to_hbm [thread:$0]  (%p2022_p0), %s1238_s13, 128, %s1240_s17, %s1219_s1  }
 0x719 PF: > { %s2290_s23 = sld [smem:[#allocation18_spill]]  ;;  %p1531_p10 = pnand %p1411_p6, %p2029_p5 }
 0x71b   : > { %p1532_p12 = pneg %p1531_p10 }
 0x71f   : > { %s1269_s6 = sand.u32 1, %s2290_s23  }
 0x720   : > { %s1270_s30 = scalar_lea.sflag [#allocation7], %s1269_s6 }
 0x721   : > { %1814 = dma.done.wait (%p1532_p12), %s1270_s30, 128  }
 0x722   : > { %1816 = vsyncadd (%p1532_p12), %s1270_s30, 4294967168  ;;  %s1280_s14 = scalar_lea.sflag [#allocation13], %s1269_s6 }
 0x723   : > { %1818 = dma.done.wait (%p1532_p12), %s1280_s14, 256  }
 0x724   : > { %1820 = vsyncadd (%p1532_p12), %s1280_s14, 4294967040  ;;  %s38_s29 = sadd.s32 1, %s1843_s29   ;;  %s2291_s27 = sld [smem:[#allocation19_spill]] }
 0x725   : > { %p35_p13 = scmp.ge.s32.totalorder %s38_s29, 4   ;;  %s2292_s28 = sld [smem:[#allocation20_spill]] }
 0x726   : > { %s2293_s24 = smov %s1827_s25  ;;  %s2294_s25 = smov %s1831_s26 }
 0x727   : > { %s2295_s26 = smov %s2027_s0  ;;  %37 = sbr.rel (!%p35_p13) target bundleno = 22 (0x16), region = 164 }
 0x72c   :  { %1286 = vsyncpa [#allocation6], 1 }
 0x72d   :  { %1288 = vsyncpa [#allocation6 + $0x1], 1 }
 0x72e   :  { %1289 = vsyncpa [#allocation9], 1 }
 0x72f   :  { %1290 = vsyncpa [#allocation7], 1 }
 0x730   :  { %1292 = vsyncpa [#allocation7 + $0x1], 1 }
 0x731   :  { %1293 = vsyncpa [#allocation13], 1 }
 0x732   :  { %1295 = vsyncpa [#allocation13 + $0x1], 1 }

</bundles_post_ra>
